<compile_context>
chip_gen: v7x
topology: tpu7x:2x2x1
jax: 0.10.0
libtpu: 0.0.40
codegen_flags: <defaults>
</compile_context>

<pallas_src>
import numpy as np

import jax
import jax.numpy as jnp
from jax import lax
from jax.experimental import pallas as pl
from jax.experimental.pallas import tpu as pltpu

_LANES = 128


# ----------------------------------------------------------------------------
# Fused Pallas kernel: conv1 + pool -> conv2 + pool -> fc1 -> fc2
# ----------------------------------------------------------------------------
def _simple_cnn_kernel(a1_ref, w1_ref, b1_ref, w2_ref, b2_ref,
                       f1_ref, fb1_ref, f2_ref, fb2_ref, o_ref):
    """One batch tile of the whole forward pass, everything resident in VMEM.

    a1_ref : (28, tb, 160)  conv1 LHS, kh taps pre-folded into K (bf16)
    w1_ref : (160, 256)     conv1 Toeplitz slab, N = [even 128 | odd 128]
    b1_ref : (1, 128) f32   conv1 bias (cols 112..127 zero)
    w2_ref : (640, 256)     conv2 Toeplitz slab (kh folded into K)
    b2_ref : (1, 128) f32
    f1_ref : (896, 256)     fc1 weights permuted to the conv2 output layout
    fb1_ref: (1, 256) f32
    f2_ref : (256, 128)     fc2 weights, output padded 10 -> 128
    fb2_ref: (1, 128) f32
    o_ref  : (tb, 128) f32  logits (cols 10..127 zero)
    """
    L = _LANES
    tb = a1_ref.shape[1]
    H1, H2, Hf, KH = 28, 14, 7, 5

    # ---- conv1 (5x5, pad=2): single MXU matmul, K = 5*32 = 160.
    a1 = a1_ref[...].reshape(H1 * tb, a1_ref.shape[2])        # rows = (h, b)
    z1 = jnp.dot(a1, w1_ref[...], preferred_element_type=jnp.float32)
    # width max-pool (even/odd parity slabs), bias, ReLU, height max-pool.
    y1 = jnp.maximum(z1[:, :L], z1[:, L:]) + b1_ref[...]
    y1 = jnp.maximum(y1, 0.0).reshape(H2, 2 * tb, L)
    y1 = jnp.maximum(y1[:, :tb, :], y1[:, tb:, :]).astype(a1.dtype)  # (14,tb,128)

    # ---- conv2 (5x5, pad=2): height pad via zero rows, kh folded into K=640.
    zrows = jnp.zeros((2, tb, L), y1.dtype)
    x2 = jnp.concatenate([zrows, y1, zrows], axis=0)                  # (18,tb,128)
    a2 = jnp.concatenate(
        [x2[kh:kh + H2].reshape(H2 * tb, L) for kh in range(KH)], axis=1)
    z2 = jnp.dot(a2, w2_ref[...], preferred_element_type=jnp.float32)
    y2 = jnp.maximum(z2[:, :L], z2[:, L:]) + b2_ref[...]
    y2 = jnp.maximum(y2, 0.0).reshape(Hf, 2 * tb, L)
    y2 = jnp.maximum(y2[:, :tb, :], y2[:, tb:, :]).astype(a1.dtype)   # (7,tb,128)

    # ---- fc head: fold the 7 feature rows into K=896 (128-aligned concat).
    af = jnp.concatenate([y2[h] for h in range(Hf)], axis=1)          # (tb,896)
    h1 = jnp.dot(af, f1_ref[...], preferred_element_type=jnp.float32)
    h1 = jnp.maximum(h1 + fb1_ref[...], 0.0).astype(f2_ref.dtype)
    logits = jnp.dot(h1, f2_ref[...], preferred_element_type=jnp.float32)
    o_ref[...] = logits + fb2_ref[...]


# ----------------------------------------------------------------------------
# Tiling heuristic
# ----------------------------------------------------------------------------
def _round_up(x, m):
    return -(-x // m) * m


def _pick_tiles(B):
    # Batch tile up to 128 rows (VMEM-safe for the fully fused kernel) and
    # always >= 2 grid steps so the parallel axis shards across v7x's two TCs.
    tb = min(128, _round_up(max(B // 2, 1), 16))
    B_pad = max(_round_up(B, tb), 2 * tb)
    return tb, B_pad


# ----------------------------------------------------------------------------
# Forward pass
# ----------------------------------------------------------------------------
def simple_cnn_forward(packed, x_nchw):
    B = x_nchw.shape[0]
    tb, B_pad = _pick_tiles(B)
    act_dtype = packed["w1"].dtype

    # NCHW (B,1,28,28) -> height-major (h, b, w); pad h/w by 2 (the conv1
    # padding) and the batch to B_pad, then fold conv1's 5 kh taps into the
    # GEMM K axis (lane concat done once in XLA on the tiny first-layer input
    # so the kernel sees a single aligned (28, tb, 160) LHS block).
    x = jnp.transpose(x_nchw[:, 0, :, :], (1, 0, 2))                  # (28,B,28)
    x = jnp.pad(x, ((2, 2), (0, B_pad - B), (2, 2))).astype(act_dtype)
    a1 = jnp.concatenate([x[kh:kh + 28] for kh in range(5)], axis=-1)  # (28,B_pad,160)

    out = pl.pallas_call(
        _simple_cnn_kernel,
        out_shape=jax.ShapeDtypeStruct((B_pad, _LANES), jnp.float32),
        grid_spec=pltpu.PrefetchScalarGridSpec(
            num_scalar_prefetch=0,
            grid=(B_pad // tb,),
            in_specs=[
                pl.BlockSpec((28, tb, 160), lambda i: (0, i, 0)),
                pl.BlockSpec((160, 256), lambda i: (0, 0)),
                pl.BlockSpec((1, 128), lambda i: (0, 0)),
                pl.BlockSpec((640, 256), lambda i: (0, 0)),
                pl.BlockSpec((1, 128), lambda i: (0, 0)),
                pl.BlockSpec((896, 256), lambda i: (0, 0)),
                pl.BlockSpec((1, 256), lambda i: (0, 0)),
                pl.BlockSpec((256, 128), lambda i: (0, 0)),
                pl.BlockSpec((1, 128), lambda i: (0, 0)),
            ],
            out_specs=pl.BlockSpec((tb, _LANES), lambda i: (i, 0)),
        ),
        compiler_params=pltpu.CompilerParams(
            dimension_semantics=("parallel",),
            vmem_limit_bytes=64 * 1024 * 1024,
        ),
    )(a1, packed["w1"], packed["b1"], packed["w2"], packed["b2"],
      packed["f1w"], packed["fb1"], packed["f2w"], packed["fb2"])

    return out[:B, :10]


# ----------------------------------------------------------------------------
# Parameters: init + one-time pre-packing into GEMM-ready slabs
# ----------------------------------------------------------------------------
def init_params(key):
    """Deterministic synthetic init with PyTorch-default-style fan-in bounds."""
    ks = jax.random.split(key, 8)

    def u(k, shape, fan_in):
        bound = 1.0 / np.sqrt(float(fan_in))
        return jax.random.uniform(k, shape, jnp.float32, -bound, bound)

    return {
        "conv1_w": u(ks[0], (8, 1, 5, 5), 1 * 25),
        "conv1_b": u(ks[1], (8,), 1 * 25),
        "conv2_w": u(ks[2], (16, 8, 5, 5), 8 * 25),
        "conv2_b": u(ks[3], (16,), 8 * 25),
        "fc1_w":   u(ks[4], (256, 16 * 7 * 7), 16 * 7 * 7),
        "fc1_b":   u(ks[5], (256,), 16 * 7 * 7),
        "fc2_w":   u(ks[6], (10, 256), 256),
        "fc2_b":   u(ks[7], (10,), 256),
    }


def prepack_params(params, dtype=jnp.bfloat16):
    """One-time repack of PyTorch-layout weights into kernel-ready slabs."""
    L = _LANES

    def conv_slab(w, b, n_wo, k_block, pad_left, w_in_max):
        # slab[kh*k_block + w_in*Cin + c, p*128 + wo*Cout + co] = w[co,c,kh,kw]
        # with w_in = 2*wo + p + kw - pad_left; out-of-range taps (the width
        # conv padding) are simply dropped, padded N columns stay zero.
        w = np.asarray(w, np.float32)                   # (Cout, Cin, 5, 5)
        Cout, Cin, KH, KW = w.shape
        w4 = np.transpose(w, (2, 3, 1, 0))              # (KH, KW, Cin, Cout)
        m = np.zeros((KH, k_block, 2, L), np.float32)
        for kw in range(KW):
            for wo in range(n_wo):
                for p in range(2):
                    w_in = 2 * wo + p + kw - pad_left
                    if 0 <= w_in < w_in_max:
                        m[:, w_in * Cin:(w_in + 1) * Cin,
                          p, wo * Cout:(wo + 1) * Cout] = w4[:, kw]
        slab = jnp.asarray(m.reshape(KH * k_block, 2 * L), dtype)
        brow = np.zeros((1, L), np.float32)
        brow[0, :n_wo * Cout] = np.tile(np.asarray(b, np.float32), n_wo)
        return slab, jnp.asarray(brow)

    # conv1: input pre-padded in width (Wp=32), per-kh K block = 32.
    w1, b1 = conv_slab(params["conv1_w"], params["conv1_b"],
                       n_wo=14, k_block=32, pad_left=0, w_in_max=32)
    # conv2: input is conv1's 128-lane output (14*8 real + 16 zero cols),
    # width padding folded into the slab; per-kh K block = 128.
    w2, b2 = conv_slab(params["conv2_w"], params["conv2_b"],
                       n_wo=7, k_block=128, pad_left=2, w_in_max=14)

    # fc1: permute torch's (c, h, w) flatten order to the kernel's
    # (h-block of 128, w*16 + c) layout; padded feature rows stay zero.
    f1 = np.asarray(params["fc1_w"], np.float32).reshape(256, 16, 7, 7)
    f1 = np.transpose(f1, (2, 3, 1, 0))                 # (h, w, c, out)
    f1m = np.zeros((7, L, 256), np.float32)
    f1m[:, :112, :] = f1.reshape(7, 112, 256)
    fb1 = np.asarray(params["fc1_b"], np.float32)[None, :]

    # fc2: transpose and pad the 10 output columns to a full 128-lane slab.
    f2m = np.zeros((256, L), np.float32)
    f2m[:, :10] = np.asarray(params["fc2_w"], np.float32).T
    fb2 = np.zeros((1, L), np.float32)
    fb2[0, :10] = np.asarray(params["fc2_b"], np.float32)

    return {
        "w1": w1, "b1": b1, "w2": w2, "b2": b2,
        "f1w": jnp.asarray(f1m.reshape(7 * L, 256), dtype),
        "fb1": jnp.asarray(fb1),
        "f2w": jnp.asarray(f2m, dtype),
        "fb2": jnp.asarray(fb2),
    }


# ----------------------------------------------------------------------------
# Pure-JAX reference (float32) for a tolerance check
# ----------------------------------------------------------------------------
def _reference_forward(params, x):
    def conv(x, w, b):
        y = lax.conv_general_dilated(
            x, w, (1, 1), ((2, 2), (2, 2)),
            dimension_numbers=("NCHW", "OIHW", "NCHW"))
        return y + b[None, :, None, None]

    def pool(x):
        return lax.reduce_window(x, -jnp.inf, lax.max,
                                 (1, 1, 2, 2), (1, 1, 2, 2), "VALID")

    y = pool(jax.nn.relu(conv(x, params["conv1_w"], params["conv1_b"])))
    y = pool(jax.nn.relu(conv(y, params["conv2_w"], params["conv2_b"])))
    y = y.reshape(y.shape[0], -1)
    y = jax.nn.relu(y @ params["fc1_w"].T + params["fc1_b"])
    return y @ params["fc2_w"].T + params["fc2_b"]


if __name__ == "__main__":
    key = jax.random.PRNGKey(0)
    pkey, xkey = jax.random.split(key)
    params = init_params(pkey)
    packed = prepack_params(params)

    x = jax.random.normal(xkey, (2, 1, 28, 28), jnp.float32)
    logits = jax.jit(simple_cnn_forward)(packed, x)
    jax.block_until_ready(logits)
    assert logits.shape == (2, 10) and logits.dtype == jnp.float32

    # bf16 storage / f32-accumulation kernel vs float32 reference.
    ref = _reference_forward(params, x)
    np.testing.assert_allclose(np.asarray(logits), np.asarray(ref),
                               rtol=0.1, atol=0.1)
    print("KERNEL_OK")
</pallas_src>

<mosaic_0001>
module attributes {stable_mosaic.version = 11 : i64} {
  func.func @_simple_cnn_kernel(%arg0: i32, %arg1: memref<28x16x160xbf16, #tpu.memory_space<vmem>>, %arg2: memref<160x256xbf16, #tpu.memory_space<vmem>>, %arg3: memref<1x128xf32, #tpu.memory_space<vmem>>, %arg4: memref<640x256xbf16, #tpu.memory_space<vmem>>, %arg5: memref<1x128xf32, #tpu.memory_space<vmem>>, %arg6: memref<896x256xbf16, #tpu.memory_space<vmem>>, %arg7: memref<1x256xf32, #tpu.memory_space<vmem>>, %arg8: memref<256x128xbf16, #tpu.memory_space<vmem>>, %arg9: memref<1x128xf32, #tpu.memory_space<vmem>>, %arg10: memref<16x128xf32, #tpu.memory_space<vmem>>) attributes {dimension_semantics = [#tpu.dimension_semantics<parallel>], iteration_bounds = array<i64: 2>, scalar_prefetch = 0 : i64, scratch_operands = 0 : i64, tpu.core_type = #tpu.core_type<tc>, window_params = [{transform_indices = @transform_0, window_bounds = array<i64: 28, 16, 160>}, {pipeline_mode = #tpu.pipeline_mode<synchronous>, transform_indices = @transform_1, window_bounds = array<i64: 160, 256>}, {pipeline_mode = #tpu.pipeline_mode<synchronous>, transform_indices = @transform_2, window_bounds = array<i64: 1, 128>}, {pipeline_mode = #tpu.pipeline_mode<synchronous>, transform_indices = @transform_3, window_bounds = array<i64: 640, 256>}, {pipeline_mode = #tpu.pipeline_mode<synchronous>, transform_indices = @transform_4, window_bounds = array<i64: 1, 128>}, {pipeline_mode = #tpu.pipeline_mode<synchronous>, transform_indices = @transform_5, window_bounds = array<i64: 896, 256>}, {pipeline_mode = #tpu.pipeline_mode<synchronous>, transform_indices = @transform_6, window_bounds = array<i64: 1, 256>}, {pipeline_mode = #tpu.pipeline_mode<synchronous>, transform_indices = @transform_7, window_bounds = array<i64: 256, 128>}, {pipeline_mode = #tpu.pipeline_mode<synchronous>, transform_indices = @transform_8, window_bounds = array<i64: 1, 128>}, {transform_indices = @transform_9, window_bounds = array<i64: 16, 128>}]} {
    %c0 = arith.constant 0 : index
    %c0_0 = arith.constant 0 : index
    %c0_1 = arith.constant 0 : index
    %0 = vector.load %arg1[%c0, %c0_0, %c0_1] : memref<28x16x160xbf16, #tpu.memory_space<vmem>>, vector<28x16x160xbf16>
    %1 = vector.shape_cast %0 : vector<28x16x160xbf16> to vector<448x160xbf16>
    %c0_2 = arith.constant 0 : index
    %c0_3 = arith.constant 0 : index
    %2 = vector.load %arg2[%c0_2, %c0_3] : memref<160x256xbf16, #tpu.memory_space<vmem>>, vector<160x256xbf16>
    %cst = arith.constant dense<0.000000e+00> : vector<448x256xf32>
    %3 = tpu.matmul %1, %2, %cst {dimension_numbers = #tpu.dot_dimension_numbers<[1], [0], [0], [1], [0, 0, 1, 1], [], []>} : vector<448x160xbf16>, vector<160x256xbf16>, vector<448x256xf32> -> vector<448x256xf32>
    %4 = vector.extract_strided_slice %3 {offsets = [0, 0], sizes = [448, 128], strides = [1, 1]} : vector<448x256xf32> to vector<448x128xf32>
    %5 = vector.extract_strided_slice %3 {offsets = [0, 128], sizes = [448, 128], strides = [1, 1]} : vector<448x256xf32> to vector<448x128xf32>
    %6 = arith.maximumf %4, %5 : vector<448x128xf32>
    %c0_4 = arith.constant 0 : index
    %c0_5 = arith.constant 0 : index
    %7 = vector.load %arg3[%c0_4, %c0_5] : memref<1x128xf32, #tpu.memory_space<vmem>>, vector<1x128xf32>
    %8 = vector.broadcast %7 : vector<1x128xf32> to vector<448x128xf32>
    %9 = arith.addf %6, %8 : vector<448x128xf32>
    %cst_6 = arith.constant 0.000000e+00 : f32
    %10 = vector.broadcast %cst_6 : f32 to vector<448x128xf32>
    %11 = arith.maximumf %9, %10 : vector<448x128xf32>
    %12 = vector.shape_cast %11 : vector<448x128xf32> to vector<14x32x128xf32>
    %13 = vector.extract_strided_slice %12 {offsets = [0, 0, 0], sizes = [14, 16, 128], strides = [1, 1, 1]} : vector<14x32x128xf32> to vector<14x16x128xf32>
    %14 = vector.extract_strided_slice %12 {offsets = [0, 16, 0], sizes = [14, 16, 128], strides = [1, 1, 1]} : vector<14x32x128xf32> to vector<14x16x128xf32>
    %15 = arith.maximumf %13, %14 : vector<14x16x128xf32>
    %16 = arith.truncf %15 : vector<14x16x128xf32> to vector<14x16x128xbf16>
    %cst_7 = arith.constant 0.000000e+00 : bf16
    %17 = vector.broadcast %cst_7 : bf16 to vector<2x16x128xbf16>
    %18 = tpu.concatenate %17, %16, %17 in 0 : vector<2x16x128xbf16>, vector<14x16x128xbf16>, vector<2x16x128xbf16> -> vector<18x16x128xbf16>
    %19 = vector.extract_strided_slice %18 {offsets = [0, 0, 0], sizes = [14, 16, 128], strides = [1, 1, 1]} : vector<18x16x128xbf16> to vector<14x16x128xbf16>
    %20 = vector.shape_cast %19 : vector<14x16x128xbf16> to vector<224x128xbf16>
    %21 = vector.extract_strided_slice %18 {offsets = [1, 0, 0], sizes = [14, 16, 128], strides = [1, 1, 1]} : vector<18x16x128xbf16> to vector<14x16x128xbf16>
    %22 = vector.shape_cast %21 : vector<14x16x128xbf16> to vector<224x128xbf16>
    %23 = vector.extract_strided_slice %18 {offsets = [2, 0, 0], sizes = [14, 16, 128], strides = [1, 1, 1]} : vector<18x16x128xbf16> to vector<14x16x128xbf16>
    %24 = vector.shape_cast %23 : vector<14x16x128xbf16> to vector<224x128xbf16>
    %25 = vector.extract_strided_slice %18 {offsets = [3, 0, 0], sizes = [14, 16, 128], strides = [1, 1, 1]} : vector<18x16x128xbf16> to vector<14x16x128xbf16>
    %26 = vector.shape_cast %25 : vector<14x16x128xbf16> to vector<224x128xbf16>
    %27 = vector.extract_strided_slice %18 {offsets = [4, 0, 0], sizes = [14, 16, 128], strides = [1, 1, 1]} : vector<18x16x128xbf16> to vector<14x16x128xbf16>
    %28 = vector.shape_cast %27 : vector<14x16x128xbf16> to vector<224x128xbf16>
    %29 = tpu.concatenate %20, %22, %24, %26, %28 in 1 : vector<224x128xbf16>, vector<224x128xbf16>, vector<224x128xbf16>, vector<224x128xbf16>, vector<224x128xbf16> -> vector<224x640xbf16>
    %c0_8 = arith.constant 0 : index
    %c0_9 = arith.constant 0 : index
    %30 = vector.load %arg4[%c0_8, %c0_9] : memref<640x256xbf16, #tpu.memory_space<vmem>>, vector<640x256xbf16>
    %cst_10 = arith.constant dense<0.000000e+00> : vector<224x256xf32>
    %31 = tpu.matmul %29, %30, %cst_10 {dimension_numbers = #tpu.dot_dimension_numbers<[1], [0], [0], [1], [0, 0, 1, 1], [], []>} : vector<224x640xbf16>, vector<640x256xbf16>, vector<224x256xf32> -> vector<224x256xf32>
    %32 = vector.extract_strided_slice %31 {offsets = [0, 0], sizes = [224, 128], strides = [1, 1]} : vector<224x256xf32> to vector<224x128xf32>
    %33 = vector.extract_strided_slice %31 {offsets = [0, 128], sizes = [224, 128], strides = [1, 1]} : vector<224x256xf32> to vector<224x128xf32>
    %34 = arith.maximumf %32, %33 : vector<224x128xf32>
    %c0_11 = arith.constant 0 : index
    %c0_12 = arith.constant 0 : index
    %35 = vector.load %arg5[%c0_11, %c0_12] : memref<1x128xf32, #tpu.memory_space<vmem>>, vector<1x128xf32>
    %36 = vector.broadcast %35 : vector<1x128xf32> to vector<224x128xf32>
    %37 = arith.addf %34, %36 : vector<224x128xf32>
    %cst_13 = arith.constant 0.000000e+00 : f32
    %38 = vector.broadcast %cst_13 : f32 to vector<224x128xf32>
    %39 = arith.maximumf %37, %38 : vector<224x128xf32>
    %40 = vector.shape_cast %39 : vector<224x128xf32> to vector<7x32x128xf32>
    %41 = vector.extract_strided_slice %40 {offsets = [0, 0, 0], sizes = [7, 16, 128], strides = [1, 1, 1]} : vector<7x32x128xf32> to vector<7x16x128xf32>
    %42 = vector.extract_strided_slice %40 {offsets = [0, 16, 0], sizes = [7, 16, 128], strides = [1, 1, 1]} : vector<7x32x128xf32> to vector<7x16x128xf32>
    %43 = arith.maximumf %41, %42 : vector<7x16x128xf32>
    %44 = arith.truncf %43 : vector<7x16x128xf32> to vector<7x16x128xbf16>
    %45 = vector.extract_strided_slice %44 {offsets = [0, 0, 0], sizes = [1, 16, 128], strides = [1, 1, 1]} : vector<7x16x128xbf16> to vector<1x16x128xbf16>
    %46 = vector.shape_cast %45 : vector<1x16x128xbf16> to vector<16x128xbf16>
    %47 = vector.extract_strided_slice %44 {offsets = [1, 0, 0], sizes = [1, 16, 128], strides = [1, 1, 1]} : vector<7x16x128xbf16> to vector<1x16x128xbf16>
    %48 = vector.shape_cast %47 : vector<1x16x128xbf16> to vector<16x128xbf16>
    %49 = vector.extract_strided_slice %44 {offsets = [2, 0, 0], sizes = [1, 16, 128], strides = [1, 1, 1]} : vector<7x16x128xbf16> to vector<1x16x128xbf16>
    %50 = vector.shape_cast %49 : vector<1x16x128xbf16> to vector<16x128xbf16>
    %51 = vector.extract_strided_slice %44 {offsets = [3, 0, 0], sizes = [1, 16, 128], strides = [1, 1, 1]} : vector<7x16x128xbf16> to vector<1x16x128xbf16>
    %52 = vector.shape_cast %51 : vector<1x16x128xbf16> to vector<16x128xbf16>
    %53 = vector.extract_strided_slice %44 {offsets = [4, 0, 0], sizes = [1, 16, 128], strides = [1, 1, 1]} : vector<7x16x128xbf16> to vector<1x16x128xbf16>
    %54 = vector.shape_cast %53 : vector<1x16x128xbf16> to vector<16x128xbf16>
    %55 = vector.extract_strided_slice %44 {offsets = [5, 0, 0], sizes = [1, 16, 128], strides = [1, 1, 1]} : vector<7x16x128xbf16> to vector<1x16x128xbf16>
    %56 = vector.shape_cast %55 : vector<1x16x128xbf16> to vector<16x128xbf16>
    %57 = vector.extract_strided_slice %44 {offsets = [6, 0, 0], sizes = [1, 16, 128], strides = [1, 1, 1]} : vector<7x16x128xbf16> to vector<1x16x128xbf16>
    %58 = vector.shape_cast %57 : vector<1x16x128xbf16> to vector<16x128xbf16>
    %59 = tpu.concatenate %46, %48, %50, %52, %54, %56, %58 in 1 : vector<16x128xbf16>, vector<16x128xbf16>, vector<16x128xbf16>, vector<16x128xbf16>, vector<16x128xbf16>, vector<16x128xbf16>, vector<16x128xbf16> -> vector<16x896xbf16>
    %c0_14 = arith.constant 0 : index
    %c0_15 = arith.constant 0 : index
    %60 = vector.load %arg6[%c0_14, %c0_15] : memref<896x256xbf16, #tpu.memory_space<vmem>>, vector<896x256xbf16>
    %cst_16 = arith.constant dense<0.000000e+00> : vector<16x256xf32>
    %61 = tpu.matmul %59, %60, %cst_16 {dimension_numbers = #tpu.dot_dimension_numbers<[1], [0], [0], [1], [0, 0, 1, 1], [], []>} : vector<16x896xbf16>, vector<896x256xbf16>, vector<16x256xf32> -> vector<16x256xf32>
    %c0_17 = arith.constant 0 : index
    %c0_18 = arith.constant 0 : index
    %62 = vector.load %arg7[%c0_17, %c0_18] : memref<1x256xf32, #tpu.memory_space<vmem>>, vector<1x256xf32>
    %63 = vector.broadcast %62 : vector<1x256xf32> to vector<16x256xf32>
    %64 = arith.addf %61, %63 : vector<16x256xf32>
    %cst_19 = arith.constant 0.000000e+00 : f32
    %65 = vector.broadcast %cst_19 : f32 to vector<16x256xf32>
    %66 = arith.maximumf %64, %65 : vector<16x256xf32>
    %67 = arith.truncf %66 : vector<16x256xf32> to vector<16x256xbf16>
    %c0_20 = arith.constant 0 : index
    %c0_21 = arith.constant 0 : index
    %68 = vector.load %arg8[%c0_20, %c0_21] : memref<256x128xbf16, #tpu.memory_space<vmem>>, vector<256x128xbf16>
    %cst_22 = arith.constant dense<0.000000e+00> : vector<16x128xf32>
    %69 = tpu.matmul %67, %68, %cst_22 {dimension_numbers = #tpu.dot_dimension_numbers<[1], [0], [0], [1], [0, 0, 1, 1], [], []>} : vector<16x256xbf16>, vector<256x128xbf16>, vector<16x128xf32> -> vector<16x128xf32>
    %c0_23 = arith.constant 0 : index
    %c0_24 = arith.constant 0 : index
    %70 = vector.load %arg9[%c0_23, %c0_24] : memref<1x128xf32, #tpu.memory_space<vmem>>, vector<1x128xf32>
    %71 = vector.broadcast %70 : vector<1x128xf32> to vector<16x128xf32>
    %72 = arith.addf %69, %71 : vector<16x128xf32>
    %c0_25 = arith.constant 0 : index
    %c0_26 = arith.constant 0 : index
    %73 = vector.load %arg10[%c0_25, %c0_26] : memref<16x128xf32, #tpu.memory_space<vmem>>, vector<16x128xf32>
    tpu.vector_store %arg10[%c0_25, %c0_26], %72 {strides = array<i32>} : memref<16x128xf32, #tpu.memory_space<vmem>>, vector<16x128xf32>,
    return
  }
  func.func @transform_0(%arg0: i32) -> (i32, i32, i32) {
    %c0_i32 = arith.constant 0 : i32
    %c0_i32_0 = arith.constant 0 : i32
    %c0_i32_1 = arith.constant 0 : i32
    return %c0_i32, %arg0, %c0_i32_0 : i32, i32, i32
  }
  func.func @transform_1(%arg0: i32) -> (i32, i32) {
    %c0_i32 = arith.constant 0 : i32
    %c0_i32_0 = arith.constant 0 : i32
    %c0_i32_1 = arith.constant 0 : i32
    return %c0_i32, %c0_i32_0 : i32, i32
  }
  func.func @transform_2(%arg0: i32) -> (i32, i32) {
    %c0_i32 = arith.constant 0 : i32
    %c0_i32_0 = arith.constant 0 : i32
    %c0_i32_1 = arith.constant 0 : i32
    return %c0_i32, %c0_i32_0 : i32, i32
  }
  func.func @transform_3(%arg0: i32) -> (i32, i32) {
    %c0_i32 = arith.constant 0 : i32
    %c0_i32_0 = arith.constant 0 : i32
    %c0_i32_1 = arith.constant 0 : i32
    return %c0_i32, %c0_i32_0 : i32, i32
  }
  func.func @transform_4(%arg0: i32) -> (i32, i32) {
    %c0_i32 = arith.constant 0 : i32
    %c0_i32_0 = arith.constant 0 : i32
    %c0_i32_1 = arith.constant 0 : i32
    return %c0_i32, %c0_i32_0 : i32, i32
  }
  func.func @transform_5(%arg0: i32) -> (i32, i32) {
    %c0_i32 = arith.constant 0 : i32
    %c0_i32_0 = arith.constant 0 : i32
    %c0_i32_1 = arith.constant 0 : i32
    return %c0_i32, %c0_i32_0 : i32, i32
  }
  func.func @transform_6(%arg0: i32) -> (i32, i32) {
    %c0_i32 = arith.constant 0 : i32
    %c0_i32_0 = arith.constant 0 : i32
    %c0_i32_1 = arith.constant 0 : i32
    return %c0_i32, %c0_i32_0 : i32, i32
  }
  func.func @transform_7(%arg0: i32) -> (i32, i32) {
    %c0_i32 = arith.constant 0 : i32
    %c0_i32_0 = arith.constant 0 : i32
    %c0_i32_1 = arith.constant 0 : i32
    return %c0_i32, %c0_i32_0 : i32, i32
  }
  func.func @transform_8(%arg0: i32) -> (i32, i32) {
    %c0_i32 = arith.constant 0 : i32
    %c0_i32_0 = arith.constant 0 : i32
    %c0_i32_1 = arith.constant 0 : i32
    return %c0_i32, %c0_i32_0 : i32, i32
  }
  func.func @transform_9(%arg0: i32) -> (i32, i32) {
    %c0_i32 = arith.constant 0 : i32
    %c0_i32_0 = arith.constant 0 : i32
    return %arg0, %c0_i32 : i32, i32
  }
}

</mosaic_0001>

<bundles_post_ra>
// kernel: simple_cnn_forward.1
= control target key start
LH: loop header
LB: loop body
LE: loop exit
PB: predicated region body
PF: predicated region fallthrough
CT: control target
= control target key end

     0   :  { %s5940_s0 = inlined_call_operand.hbm [shape: bf16[28,32,160], index: 0, kind: input, shape index: {}]   ;;  %s5941_s1 = inlined_call_operand.hbm [shape: bf16[160,256], index: 1, kind: input, shape index: {}]   ;;  %s5942_s2 = inlined_call_operand.hbm [shape: f32[1,128], index: 2, kind: input, shape index: {}]   ;;  %s5943_s3 = inlined_call_operand.hbm [shape: bf16[640,256], index: 3, kind: input, shape index: {}]   ;;  %s5944_s4 = inlined_call_operand.hbm [shape: f32[1,128], index: 4, kind: input, shape index: {}]   ;;  %s5945_s5 = inlined_call_operand.hbm [shape: bf16[896,256], index: 5, kind: input, shape index: {}]   ;;  %s5946_s6 = inlined_call_operand.hbm [shape: f32[1,256], index: 6, kind: input, shape index: {}]   ;;  %s5947_s7 = inlined_call_operand.hbm [shape: bf16[256,128], index: 7, kind: input, shape index: {}]   ;;  %s5948_s8 = inlined_call_operand.hbm [shape: f32[1,128], index: 8, kind: input, shape index: {}]   ;;  %s5949_s9 = inlined_call_operand.hbm [shape: f32[32,128], index: 9, kind: output, shape index: {}]  }
   0x1   :  { %5964 = sst [smem:[#allocation33_spill]] %s5941_s1 }
   0x2   :  { %5965 = sst [smem:[#allocation34_spill]] %s5943_s3 }
   0x3   :  { %5966 = sst [smem:[#allocation35_spill]] %s5949_s9 }
   0x4   :  { %14 = vsyncpa [#allocation3], 0 }
   0x5   :  { %16 = vsyncpa [#allocation3 + $0x1], 0 }
   0x6   :  { %17 = vsyncpa [#allocation6], 0 }
   0x7   :  { %18 = vsyncpa [#allocation9], 0 }
   0x8   :  { %19 = vsyncpa [#allocation12], 0 }
   0x9   :  { %20 = vsyncpa [#allocation15], 0 }
   0xa   :  { %21 = vsyncpa [#allocation4], 0 }
   0xb   :  { %23 = vsyncpa [#allocation4 + $0x1], 0  ;;  %s5286_s30 = smov 0   ;;  %s5288_s10 = smov 0  }
   0xc   :  { %s5290_s11 = smov 0   ;;  %s5292_s12 = smov 0  }
   0xd LB: > { %5967 = sst [smem:[#allocation27_spill]] %s5200_s30  ;;  %s5307_s13 = sadd.s32 4294967295, %s5212_s12   ;;  %s5212_s12 = sphi %s5292_s12, %s6000_s12   ;;  %s5208_s11 = sphi %s5290_s11, %s6004_s11   ;;  %s5204_s10 = sphi %s5288_s10, %s6003_s10   ;;  %s5200_s30 = sphi %s5286_s30, %s6002_s30  }
   0xe   : > { %5968 = sst [smem:[#allocation28_spill]] %s5307_s13  ;;  %s3845_s14 = sadd.s32 4294967294, %s5212_s12  }
   0xf   : > { %s5311_s15 = sadd.s32 1, %s5212_s12   ;;  %s36_s16 = sadd.s32 1, %s5208_s11 }
  0x10   : > { %5969 = sst [smem:[#allocation29_spill]] %s5311_s15  ;;  %s33_s17 = ssub.s32 %s5212_s12, %s5311_s15 }
  0x11   : > { %p43_p0 = scmp.ne.s32.totalorder %s5208_s11, %s5204_s10  ;;  %p34_p1 = scmp.eq.s32.totalorder %s33_s17, 0 }
  0x12   : > { %p44_p2 = scmp.eq.s32.totalorder %s5212_s12, 0  ;;  %p49_p3 = scmp.ne.s32.totalorder %s5204_s10, %s5200_s30 }
  0x13   : > { %p5952_p4 = scmp.eq.s32.totalorder %s5307_s13, 0  ;;  %p241_p7 = scmp.eq.s32.totalorder %s5307_s13, 1 }
  0x14   : > { %s5323_s18 = scalar_select %p34_p1, %s5208_s11, %s36_s16  }
  0x15   : > { %p5325_p5 = por %p44_p2, %p43_p0  ;;  %p5331_p6 = por %p5952_p4, %p49_p3 }
  0x16   : > { %5970 = sst [smem:[#allocation30_spill]] %s5323_s18  ;;  %p247_p8 = scmp.eq.s32.totalorder %s3845_s14, 1 }
  0x17   : > { %s5971_s19 = scalar_select %p5325_p5, 1, 0 }
  0x18   : > { %s5972_s20 = scalar_select %p5331_p6, 1, 0 }
  0x19   : > { %p3846_p9 = scmp.ge.s32.totalorder %s5212_s12, 1  ;;  %p254_p10 = scmp.lt.s32.totalorder %s5212_s12, 3 }
  0x1a   : > { %p5338_p11 = por %p241_p7, %p43_p0  ;;  %p5342_p12 = por %p247_p8, %p49_p3 }
  0x1b   : > { %p5346_p13 = pnand %p3846_p9, %p254_p10  ;;  %s5214_s24 = smov [#allocation5]  }
  0x1c   : > { %s5973_s21 = scalar_select %p5338_p11, 1, 0 }
  0x1d   : > { %s5975_s22 = scalar_select %p5342_p12, 1, 0 }
  0x1e   : > { %5974 = sst [smem:[#allocation31_spill]] %s5973_s21  ;;  %p4389_p1 = pneg %p5346_p13 }
  0x1f   : > { %5976 = sst [smem:[#allocation32_spill]] %s5975_s22  ;;  %s266_s25 = sshll.u32 %s5214_s24, 4  ;;  %s267_s25 = int_to_ptr.vmem [resolvable:$true] %s266_s25 }
  0x20   : > { %s5977_s23 = scalar_select %p5346_p13, 1, 0 }
  0x21   : > { %p5354_p2 = pnand %p4389_p1, %p5952_p4  ;;  %s5215_s27 = smov [#allocation8]  }
  0x22   : > { %s290_s28 = sshll.u32 %s5215_s27, 4  ;;  %s5979_s1 = sld [smem:[#allocation33_spill]]  ;;  %s5358_s28 = int_to_ptr.vmem [resolvable:$true] %s290_s28 }
  0x23   : > { %p5368_p3 = pneg %p5354_p2 }
  0x28   : > { %s4906_s16 = scalar_lea.hbm %s5979_s1, 2560 }
  0x29   : > { %p4907_p0 = scmp.ne.s32.totalorder %s5979_s1, %s4906_s16  ;;  %p4913_p9 = scmp.lt.u32.totalorder %s4906_s16, %s5979_s1 }
  0x2b   : > { %p4909_p7 = pnand %p5368_p3, %p4907_p0 }
  0x2d   : > { %p4910_p8 = pneg %p4909_p7 }
  0x2f   : > { %p4915_p10 = pnand %p4913_p9, %p4910_p8 }
  0x31   : > { %4918 = shalt.err (!%p4915_p10)
}
  0x32   : > { %s4919_s29 = scalar_lea.vmem %s267_s25, 2560  ;;  %p4927_p11 = scmp.lt.s32.totalorder %s267_s25, %s267_s25 }
  0x33   : > { %p4920_p1 = scmp.ne.s32.totalorder %s267_s25, %s4919_s29  ;;  %p4928_p6 = scmp.lt.s32.totalorder %s4919_s29, %s4919_s29 }
  0x35   : > { %p4922_p4 = pnand %p4920_p1, %p5368_p3  ;;  %p4929_p13 = por %p4928_p6, %p4927_p11 }
  0x37   : > { %p4923_p12 = pneg %p4922_p4 }
  0x39   : > { %p4930_p5 = pnand %p4929_p13, %p4923_p12 }
  0x3b   : > { %4933 = shalt.err (!%p4930_p5)
}
  0x3c   : > { %s5216_s18 = smov 128   ;;  %s5217_s14 = smov 8  }
  0x3d   : > { %4392 = dma.hbm_to_vmem [thread:$0]  (!%p5354_p2), %s5979_s1, 2560, %s267_s25, [#allocation6], %s5216_s18, %s5216_s18, %s5217_s14  }
  0x3e   : > { %s5981_s3 = sld [smem:[#allocation34_spill]] }
  0x44   : > { %s4934_s22 = scalar_lea.hbm %s5981_s3, 10240 }
  0x45   : > { %p4935_p4 = scmp.ne.s32.totalorder %s5981_s3, %s4934_s22  ;;  %p4941_p11 = scmp.lt.u32.totalorder %s4934_s22, %s5981_s3 }
  0x47   : > { %p4937_p5 = pnand %p4935_p4, %p5368_p3 }
  0x49   : > { %p4938_p6 = pneg %p4937_p5 }
  0x4b   : > { %p4943_p12 = pnand %p4941_p11, %p4938_p6 }
  0x4d   : > { %4946 = shalt.err (!%p4943_p12)
}
  0x4e   : > { %s4947_s25 = scalar_lea.vmem %s5358_s28, 10240  ;;  %p4955_p8 = scmp.lt.s32.totalorder %s5358_s28, %s5358_s28 }
  0x4f   : > { %p4948_p13 = scmp.ne.s32.totalorder %s5358_s28, %s4947_s25  ;;  %p4956_p9 = scmp.lt.s32.totalorder %s4947_s25, %s4947_s25 }
  0x51   : > { %p4950_p0 = pnand %p4948_p13, %p5368_p3  ;;  %p4957_p10 = por %p4956_p9, %p4955_p8 }
  0x53   : > { %p4951_p7 = pneg %p4950_p0 }
  0x55   : > { %p4958_p1 = pnand %p4957_p10, %p4951_p7 }
  0x57   : > { %4961 = shalt.err (!%p4958_p1)
}
  0x58   : > { %4398 = dma.hbm_to_vmem [thread:$0]  (!%p5354_p2), %s5981_s3, 10240, %s5358_s28, [#allocation9], %s5216_s18, %s5216_s18, %s5217_s14  }
  0x59   : > { %s5218_s21 = smov [#allocation11]   ;;  %s5219_s15 = smov [#allocation14]  }
  0x5a   : > { %s314_s22 = sshll.u32 %s5218_s21, 4  ;;  %s338_s16 = sshll.u32 %s5219_s15, 4  ;;  %s315_s22 = int_to_ptr.vmem [resolvable:$true] %s314_s22  ;;  %s339_s16 = int_to_ptr.vmem [resolvable:$true] %s338_s16 }
  0x5b   : > { %s4962_s29 = scalar_lea.hbm %s5945_s5, 14336 }
  0x5c   : > { %p4963_p4 = scmp.ne.s32.totalorder %s5945_s5, %s4962_s29  ;;  %p4969_p11 = scmp.lt.u32.totalorder %s4962_s29, %s5945_s5 }
  0x5e   : > { %p4965_p5 = pnand %p4963_p4, %p5368_p3 }
  0x60   : > { %p4966_p6 = pneg %p4965_p5 }
  0x62   : > { %p4971_p12 = pnand %p4969_p11, %p4966_p6 }
  0x64   : > { %4974 = shalt.err (!%p4971_p12)
}
  0x65   : > { %s4975_s28 = scalar_lea.vmem %s315_s22, 14336  ;;  %p4983_p8 = scmp.lt.s32.totalorder %s315_s22, %s315_s22 }
  0x66   : > { %p4976_p13 = scmp.ne.s32.totalorder %s315_s22, %s4975_s28  ;;  %p4984_p9 = scmp.lt.s32.totalorder %s4975_s28, %s4975_s28 }
  0x68   : > { %p4978_p0 = pnand %p4976_p13, %p5368_p3  ;;  %p4985_p10 = por %p4984_p9, %p4983_p8 }
  0x6a   : > { %p4979_p7 = pneg %p4978_p0 }
  0x6c   : > { %p4986_p1 = pnand %p4985_p10, %p4979_p7 }
  0x6e   : > { %4989 = shalt.err (!%p4986_p1)
}
  0x6f   : > { %4404 = dma.hbm_to_vmem [thread:$0]  (!%p5354_p2), %s5945_s5, 14336, %s315_s22, [#allocation12], %s5216_s18, %s5216_s18, %s5217_s14  }
  0x70   : > { %s4990_s15 = scalar_lea.hbm %s5947_s7, 2048 }
  0x71   : > { %p4991_p4 = scmp.ne.s32.totalorder %s5947_s7, %s4990_s15  ;;  %p4997_p11 = scmp.lt.u32.totalorder %s4990_s15, %s5947_s7 }
  0x73   : > { %p4993_p5 = pnand %p4991_p4, %p5368_p3 }
  0x75   : > { %p4994_p6 = pneg %p4993_p5 }
  0x77   : > { %p4999_p12 = pnand %p4997_p11, %p4994_p6 }
  0x79   : > { %5002 = shalt.err (!%p4999_p12)
}
  0x7a   : > { %s5003_s9 = scalar_lea.vmem %s339_s16, 2048  ;;  %p5011_p8 = scmp.lt.s32.totalorder %s339_s16, %s339_s16 }
  0x7b   : > { %p5004_p13 = scmp.ne.s32.totalorder %s339_s16, %s5003_s9  ;;  %p5012_p9 = scmp.lt.s32.totalorder %s5003_s9, %s5003_s9 }
  0x7d   : > { %p5006_p0 = pnand %p5004_p13, %p5368_p3  ;;  %p5013_p10 = por %p5012_p9, %p5011_p8 }
  0x7f   : > { %p5007_p7 = pneg %p5006_p0 }
  0x81   : > { %p5014_p1 = pnand %p5013_p10, %p5007_p7 }
  0x83   : > { %5017 = shalt.err (!%p5014_p1)
}
  0x84   : > { %s5220_s18 = smov 64   ;;  %s5221_s14 = smov 4  }
  0x85   : > { %4410 = dma.hbm_to_vmem [thread:$0]  (!%p5354_p2), %s5947_s7, 2048, %s339_s16, [#allocation15], %s5220_s18, %s5220_s18, %s5221_s14  }
  0x86   : > { %s5222_s1 = smov [#allocation7]   ;;  %s5223_s30 = smov [#allocation10]  }
  0x87   : > { %s280_s13 = sshll.u32 %s5222_s1, 4  ;;  %s304_s21 = sshll.u32 %s5223_s30, 4  ;;  %s281_s13 = int_to_ptr.vmem [resolvable:$true] %s280_s13  ;;  %s305_s21 = int_to_ptr.vmem [resolvable:$true] %s304_s21 }
  0x88   : > { %s5018_s27 = scalar_lea.hbm %s5942_s2, 16 }
  0x89   : > { %p5019_p4 = scmp.ne.s32.totalorder %s5942_s2, %s5018_s27  ;;  %p5025_p11 = scmp.lt.u32.totalorder %s5018_s27, %s5942_s2 }
  0x8b   : > { %p5021_p5 = pnand %p5019_p4, %p5368_p3 }
  0x8d   : > { %p5022_p6 = pneg %p5021_p5 }
  0x8f   : > { %p5027_p12 = pnand %p5025_p11, %p5022_p6 }
  0x91   : > { %5030 = shalt.err (!%p5027_p12)
}
  0x92   : > { %s5031_s16 = scalar_lea.vmem %s281_s13, 16  ;;  %s5038_s18 = scalar_lea.vmem %s281_s13, 32 }
  0x93   : > { %p5032_p13 = scmp.ne.s32.totalorder %s281_s13, %s5031_s16  ;;  %p5039_p8 = scmp.lt.s32.totalorder %s281_s13, %s281_s13 }
  0x94   : > { %p5040_p9 = scmp.lt.s32.totalorder %s5038_s18, %s5031_s16 }
  0x95   : > { %p5034_p0 = pnand %p5032_p13, %p5368_p3 }
  0x96   : > { %p5041_p10 = por %p5040_p9, %p5039_p8 }
  0x97   : > { %p5035_p7 = pneg %p5034_p0 }
  0x99   : > { %p5042_p1 = pnand %p5041_p10, %p5035_p7 }
  0x9b   : > { %5045 = shalt.err (!%p5042_p1)
}
  0x9c   : > { %4395 = dma.hbm_to_vmem [thread:$0]  (!%p5354_p2), %s5942_s2, 16, %s281_s13, [#allocation6]  }
  0x9d   : > { %s5046_s1 = scalar_lea.hbm %s5944_s4, 16 }
  0x9e   : > { %p5047_p4 = scmp.ne.s32.totalorder %s5944_s4, %s5046_s1  ;;  %p5053_p11 = scmp.lt.u32.totalorder %s5046_s1, %s5944_s4 }
  0xa0   : > { %p5049_p5 = pnand %p5047_p4, %p5368_p3 }
  0xa2   : > { %p5050_p6 = pneg %p5049_p5 }
  0xa4   : > { %p5055_p12 = pnand %p5053_p11, %p5050_p6 }
  0xa6   : > { %5058 = shalt.err (!%p5055_p12)
}
  0xa7   : > { %s5059_s29 = scalar_lea.vmem %s305_s21, 16  ;;  %s5066_s13 = scalar_lea.vmem %s305_s21, 32 }
  0xa8   : > { %p5060_p13 = scmp.ne.s32.totalorder %s305_s21, %s5059_s29  ;;  %p5067_p8 = scmp.lt.s32.totalorder %s305_s21, %s305_s21 }
  0xa9   : > { %p5068_p9 = scmp.lt.s32.totalorder %s5066_s13, %s5059_s29 }
  0xaa   : > { %p5062_p0 = pnand %p5060_p13, %p5368_p3 }
  0xab   : > { %p5069_p10 = por %p5068_p9, %p5067_p8 }
  0xac   : > { %p5063_p7 = pneg %p5062_p0 }
  0xae   : > { %p5070_p1 = pnand %p5069_p10, %p5063_p7 }
  0xb0   : > { %5073 = shalt.err (!%p5070_p1)
}
  0xb1   : > { %4401 = dma.hbm_to_vmem [thread:$0]  (!%p5354_p2), %s5944_s4, 16, %s305_s21, [#allocation9]  }
  0xb2   : > { %s5224_s16 = smov [#allocation13]   ;;  %s5225_s14 = smov [#allocation16]  }
  0xb3   : > { %s328_s18 = sshll.u32 %s5224_s16, 4  ;;  %s352_s22 = sshll.u32 %s5225_s14, 4  ;;  %s329_s18 = int_to_ptr.vmem [resolvable:$true] %s328_s18  ;;  %s353_s22 = int_to_ptr.vmem [resolvable:$true] %s352_s22 }
  0xb4   : > { %s5074_s1 = scalar_lea.hbm %s5946_s6, 32 }
  0xb5   : > { %p5075_p4 = scmp.ne.s32.totalorder %s5946_s6, %s5074_s1  ;;  %p5081_p11 = scmp.lt.u32.totalorder %s5074_s1, %s5946_s6 }
  0xb7   : > { %p5077_p5 = pnand %p5075_p4, %p5368_p3 }
  0xb9   : > { %p5078_p6 = pneg %p5077_p5 }
  0xbb   : > { %p5083_p12 = pnand %p5081_p11, %p5078_p6 }
  0xbd   : > { %5086 = shalt.err (!%p5083_p12)
}
  0xbe   : > { %s5087_s21 = scalar_lea.vmem %s329_s18, 32  ;;  %p5095_p8 = scmp.lt.s32.totalorder %s329_s18, %s329_s18 }
  0xbf   : > { %p5088_p13 = scmp.ne.s32.totalorder %s329_s18, %s5087_s21  ;;  %p5096_p9 = scmp.lt.s32.totalorder %s5087_s21, %s5087_s21 }
  0xc1   : > { %p5090_p0 = pnand %p5088_p13, %p5368_p3  ;;  %p5097_p10 = por %p5096_p9, %p5095_p8 }
  0xc3   : > { %p5091_p7 = pneg %p5090_p0 }
  0xc5   : > { %p5098_p1 = pnand %p5097_p10, %p5091_p7 }
  0xc7   : > { %5101 = shalt.err (!%p5098_p1)
}
  0xc8   : > { %4407 = dma.hbm_to_vmem [thread:$0]  (!%p5354_p2), %s5946_s6, 32, %s329_s18, [#allocation12]  }
  0xc9   : > { %s5102_s16 = scalar_lea.hbm %s5948_s8, 16 }
  0xca   : > { %p5103_p4 = scmp.ne.s32.totalorder %s5948_s8, %s5102_s16  ;;  %p5109_p11 = scmp.lt.u32.totalorder %s5102_s16, %s5948_s8 }
  0xcc   : > { %p5105_p5 = pnand %p5103_p4, %p5368_p3 }
  0xce   : > { %p5106_p6 = pneg %p5105_p5 }
  0xd0   : > { %p5111_p12 = pnand %p5109_p11, %p5106_p6 }
  0xd2   : > { %5114 = shalt.err (!%p5111_p12)
}
  0xd3   : > { %s5115_s30 = scalar_lea.vmem %s353_s22, 16  ;;  %s5122_s18 = scalar_lea.vmem %s353_s22, 32 }
  0xd4   : > { %p5116_p13 = scmp.ne.s32.totalorder %s353_s22, %s5115_s30  ;;  %p5123_p8 = scmp.lt.s32.totalorder %s353_s22, %s353_s22 }
  0xd5   : > { %p5124_p9 = scmp.lt.s32.totalorder %s5122_s18, %s5115_s30 }
  0xd6   : > { %p5118_p0 = pnand %p5116_p13, %p5368_p3 }
  0xd7   : > { %p5125_p10 = por %p5124_p9, %p5123_p8 }
  0xd8   : > { %p5119_p7 = pneg %p5118_p0 }
  0xda   : > { %p5126_p1 = pnand %p5125_p10, %p5119_p7 }
  0xdc   : > { %5129 = shalt.err (!%p5126_p1)
}
  0xdd   : > { %4413 = dma.hbm_to_vmem [thread:$0]  (!%p5354_p2), %s5948_s8, 16, %s353_s22, [#allocation15]  }
  0xde   : > { %p3855_p4 = scmp.ge.s32.totalorder %s5212_s12, 2 }
  0xe0   : > { %359 = sbr.rel (%p3855_p4) target bundleno = 247 (0xf7), region = 48 }
  0xe7   : > { %s363_s24 = sand.u32 1, %s5208_s11   ;;  %s4192_s26 = sshll.u32 %s5212_s12, 8 }
  0xe8   : > { %s4344_s27 = smul.u32 448, %s363_s24  ;;  %s5226_s21 = smov 512  }
  0xe9   : > { %p5982_p3 = scmp.ne.s32.totalorder %s5971_s19, 0  ;;  %s374_s25 = scalar_lea.hbm %s5940_s0, %s4192_s26 }
  0xea   : > { %s367_s16 = scalar_lea.vmem [#allocation2], %s4344_s27  ;;  %s5227_s3 = smov 256  }
  0xeb   : > { %4363 = sst [smem:[#allocation19]] (%p5982_p3), %s5226_s21  ;;  %s387_s14 = sshll.u32 %s367_s16, 4  ;;  %s388_s14 = int_to_ptr.vmem [resolvable:$true] %s387_s14 }
  0xec   : > { %s4362_s22 = scalar_select %p5982_p3, [#allocation0], [#allocation20] }
  0xed   : > { %4364 = sst [smem:[#allocation19 + $0x1]] (%p5982_p3), %s5227_s3  ;;  %s5228_s28 = smov 2  }
  0xee   : > { %s379_s9 = sld [smem:[%s4362_s22]]   ;;  %s5229_s1 = smov 128  }
  0xef   : > { %4365 = sst [smem:[#allocation19 + $0x2]] (%p5982_p3), %s5228_s28  ;;  %s5230_s30 = smov 8  }
  0xf0   : > { %4366 = sst [smem:[#allocation19 + $0x3]] (%p5982_p3), %s5229_s1  ;;  %s364_s17 = scalar_lea.sflag [#allocation3], %s363_s24 }
  0xf1   : > { %4367 = sst [smem:[#allocation19 + $0x4]] (%p5982_p3), %s5229_s1  ;;  %s5231_s27 = smov [#allocation18]  }
  0xf2   : > { %4368 = sst [smem:[#allocation19 + $0x5]] (%p5982_p3), %s5230_s30 }
  0xf4   : > { %s3859_s18 = sshll.u32 %s379_s9, 26 }
  0xf5   : > { %s3860_s15 = sadd.s32 134217728, %s3859_s18 }
  0xf6   : > { %4369 = dma.general (%p5982_p3), %s374_s25, 7168, %s388_s14, %s364_s17, %s5231_s27, [#allocation19], %s3860_s15, 0  }
  0xf7 PF: > { %p5983_p2 = scmp.ne.s32.totalorder %s5977_s23, 0 }
  0xf8   : > { %s5551_s26 = sand.u32 (!%p5983_p2), 1, %s5204_s10   ;;  %p5984_p5 = scmp.ne.s32.totalorder (!%p5983_p2), %s5972_s20, 0 }
  0xf9   : > { %412 = sbr.rel (%p5983_p2) target bundleno = 1728 (0x6c0), region = 56  ;;  %s415_s22 = scalar_lea.sflag (!%p5983_p2), [#allocation3], %s5551_s26 }
  0xfa   : > { %s4345_s21 = smul.u32 (!%p5983_p2), 448, %s5551_s26 }
  0xfc   : > { %s5555_s29 = scalar_lea.vmem (!%p5983_p2), [#allocation2], %s4345_s21 }
 0x100   : > { %5175 = dma.done.wait (%p5984_p5), %s415_s22, 7168  }
 0x101   : > { %5177 = vsyncadd (%p5984_p5), %s415_s22, 4294960128  ;;  %s5985_s19 = sld [smem:[#allocation28_spill]] }
 0x107   : > { %p5986_p6 = scmp.eq.s32.totalorder %s5985_s19, 0 }
 0x109   : > { %5179 = dma.done.wait (%p5986_p6), [#allocation6], 2576   ;;  %p5987_p11 = pmov %p5986_p6 }
 0x10a   : > { %p5988_p12 = pmov %p5986_p6 }
 0x10b   : > { %5181 = vsyncadd (%p5987_p11), [#allocation6], 4294964720 }
 0x10c   : > { %5183 = dma.done.wait (%p5988_p12), [#allocation9], 10256   ;;  %p5989_p13 = pmov %p5986_p6 }
 0x10d   : > { %p5990_p0 = pmov %p5986_p6 }
 0x10e   : > { %5185 = vsyncadd (%p5989_p13), [#allocation9], 4294957040 }
 0x10f   : > { %5187 = dma.done.wait (%p5990_p0), [#allocation12], 14368   ;;  %p5991_p7 = pmov %p5990_p0 }
 0x110   : > { %p5992_p8 = pmov %p5990_p0 }
 0x111   : > { %5189 = vsyncadd (%p5991_p7), [#allocation12], 4294952928 }
 0x112   : > { %5191 = dma.done.wait (%p5992_p8), [#allocation15], 2064   ;;  %p5993_p9 = pmov %p5990_p0 }
 0x113   : > { %v4488_v0 = vld [vmem:[#allocation5 + $0x4] ss:$8 sps:$4 sm:$0xff]   ;;  %v4490_v1 = vld [vmem:[#allocation5] ss:$8 sps:$4 sm:$0xff]   ;;  %v4491_v2 = vld [vmem:[#allocation5 + $0x14] ss:$8 sps:$4 sm:$0xff]  }
 0x114   : > { %5193 = vsyncadd (%p5993_p9), [#allocation15], 4294965232  ;;  %1001 = vmatprep.subr.bf16.mxu0 %v4488_v0  ;;  %v4493_v3 = vld [vmem:[#allocation5 + $0x10] ss:$8 sps:$4 sm:$0xff]   ;;  %v4494_v4 = vld [vmem:[#allocation5 + $0x24] ss:$8 sps:$4 sm:$0xff]  }
 0x115   : > { %1002 = vmatpush1.bf16.msra.mxu0 %v4490_v1  ;;  %v4496_v5 = vld [vmem:[#allocation5 + $0x20] ss:$8 sps:$4 sm:$0xff]   ;;  %v4497_v6 = vld [vmem:[#allocation5 + $0x34] ss:$8 sps:$4 sm:$0xff]   ;;  %v4499_v7 = vld [vmem:[#allocation5 + $0x30] ss:$8 sps:$4 sm:$0xff]  }
 0x116   : > { %1003 = vmatprep.subr.bf16.mxu0 %v4491_v2  ;;  %v4500_v8 = vld [vmem:[#allocation5 + $0x44] ss:$8 sps:$4 sm:$0xff]   ;;  %vm916_vm0 = vcmask 261120   ;;  %v4502_v10 = vld [vmem:[#allocation5 + $0x40] ss:$8 sps:$4 sm:$0xff]   ;;  %s3870_s20 = sshll.u32 %s5551_s26, 4 }
 0x117   : > { %v4520_v9 = vld [vmem:[%s5555_s29 + $0x4] ss:$8 sps:$4 sm:$0xff]   ;;  %v4503_v11 = vld [vmem:[#allocation5 + $0x54] ss:$8 sps:$4 sm:$0xff]   ;;  %v4505_v12 = vld [vmem:[#allocation5 + $0x50] ss:$8 sps:$4 sm:$0xff]  }
 0x118   : > { %3947 = vmatprep.mubr.msk.bf16.mxu0 %vm916_vm0, %v4520_v9  ;;  %v4506_v13 = vld [vmem:[#allocation5 + $0x64] ss:$8 sps:$4 sm:$0xff]   ;;  %v4508_v14 = vld [vmem:[#allocation5 + $0x60] ss:$8 sps:$4 sm:$0xff]   ;;  %v4509_v15 = vld [vmem:[#allocation5 + $0x74] ss:$8 sps:$4 sm:$0xff]  }
 0x119   : > { %1004 = vmatpush1.bf16.msra.mxu0 %v4493_v3  ;;  %v4511_v16 = vld [vmem:[#allocation5 + $0x70] ss:$8 sps:$4 sm:$0xff]   ;;  %v4512_v17 = vld [vmem:[#allocation5 + $0x84] ss:$8 sps:$4 sm:$0xff]   ;;  %v4514_v18 = vld [vmem:[#allocation5 + $0x80] ss:$8 sps:$4 sm:$0xff]  }
 0x11a   : > { %1005 = vmatprep.subr.bf16.mxu0 %v4494_v4  ;;  %v4515_v19 = vld [vmem:[#allocation5 + $0x94] ss:$8 sps:$4 sm:$0xff]   ;;  %v4517_v20 = vld [vmem:[#allocation5 + $0x90] ss:$8 sps:$4 sm:$0xff]   ;;  %v4518_v21 = vld [vmem:[%s5555_s29] ss:$8 sps:$4 sm:$0xff]  }
 0x11b   : > { %v4521_v22 = vld [vmem:[%s5555_s29 + $0x14] ss:$8 sps:$4 sm:$0xff]   ;;  %v4523_v23 = vld [vmem:[%s5555_s29 + $0x10] ss:$8 sps:$4 sm:$0xff]   ;;  %v4524_v24 = vld [vmem:[%s5555_s29 + $0x24] ss:$8 sps:$4 sm:$0xff]  }
 0x11c   : > { %v4526_v25 = vld [vmem:[%s5555_s29 + $0x20] ss:$8 sps:$4 sm:$0xff]   ;;  %v4527_v26 = vld [vmem:[%s5555_s29 + $0x34] ss:$8 sps:$4 sm:$0xff]   ;;  %v4529_v27 = vld [vmem:[%s5555_s29 + $0x30] ss:$8 sps:$4 sm:$0xff]  }
 0x11d   : > { %1006 = vmatpush1.bf16.msra.mxu0 %v4496_v5  ;;  %v4530_v28 = vld [vmem:[%s5555_s29 + $0x44] ss:$8 sps:$4 sm:$0xff]   ;;  %v4532_v29 = vld [vmem:[%s5555_s29 + $0x40] ss:$8 sps:$4 sm:$0xff]   ;;  %v4533_v30 = vld [vmem:[%s5555_s29 + $0x54] ss:$8 sps:$4 sm:$0xff]  }
 0x11e   : > { %1007 = vmatprep.subr.bf16.mxu0 %v4497_v6  ;;  %v4535_v31 = vld [vmem:[%s5555_s29 + $0x50] ss:$8 sps:$4 sm:$0xff]   ;;  %v4536_v32 = vld [vmem:[%s5555_s29 + $0x64] ss:$8 sps:$4 sm:$0xff]   ;;  %v4538_v37 = vld [vmem:[%s5555_s29 + $0x60] ss:$8 sps:$4 sm:$0xff]  }
 0x11f   : > { %v4584_v33 = vld [vmem:[#allocation8 + $0x4] ss:$8 sps:$4 sm:$0xff]   ;;  %v4586_v34 = vld [vmem:[#allocation8] ss:$8 sps:$4 sm:$0xff]   ;;  %v4587_v35 = vld [vmem:[#allocation8 + $0x14] ss:$8 sps:$4 sm:$0xff]  }
 0x120   : > { %2011 = vmatprep.subr.bf16.mxu1 %v4584_v33  ;;  %v4589_v36 = vld [vmem:[#allocation8 + $0x10] ss:$8 sps:$4 sm:$0xff]   ;;  %v4593_v39 = vld [vmem:[#allocation8 + $0x24] ss:$8 sps:$4 sm:$0xff]   ;;  %v4595_v40 = vld [vmem:[#allocation8 + $0x20] ss:$8 sps:$4 sm:$0xff]  }
 0x121   : > { %1008 = vmatpush1.bf16.msra.mxu0 %v4499_v7  ;;  %2012 = vmatpush1.bf16.msra.mxu1 %v4586_v34  ;;  %v4539_v38 = vld [vmem:[%s5555_s29 + $0x74] ss:$8 sps:$4 sm:$0xff]   ;;  %v4541_v43 = vld [vmem:[%s5555_s29 + $0x70] ss:$8 sps:$4 sm:$0xff]   ;;  %v4542_v44 = vld [vmem:[%s5555_s29 + $0x84] ss:$8 sps:$4 sm:$0xff]  }
 0x122   : > { %1009 = vmatprep.subr.bf16.mxu0 %v4500_v8  ;;  %2013 = vmatprep.subr.bf16.mxu1 %v4587_v35  ;;  %v4596_v41 = vld [vmem:[#allocation8 + $0x34] ss:$8 sps:$4 sm:$0xff]   ;;  %v4598_v42 = vld [vmem:[#allocation8 + $0x30] ss:$8 sps:$4 sm:$0xff]   ;;  %v4602_v45 = vld [vmem:[#allocation8 + $0x44] ss:$8 sps:$4 sm:$0xff]  }
 0x123   : > { %v4604_v46 = vld [vmem:[#allocation8 + $0x40] ss:$8 sps:$4 sm:$0xff]   ;;  %v4605_v47 = vld [vmem:[#allocation8 + $0x54] ss:$8 sps:$4 sm:$0xff]   ;;  %v4607_v48 = vld [vmem:[#allocation8 + $0x50] ss:$8 sps:$4 sm:$0xff]  }
 0x124   : > { %v4544_v49 = vld [vmem:[%s5555_s29 + $0x80] ss:$8 sps:$4 sm:$0xff]   ;;  %v4545_v50 = vld [vmem:[%s5555_s29 + $0x94] ss:$8 sps:$4 sm:$0xff]   ;;  %v4547_v55 = vld [vmem:[%s5555_s29 + $0x90] ss:$8 sps:$4 sm:$0xff]  }
 0x125   : > { %1010 = vmatpush1.bf16.msra.mxu0 %v4502_v10  ;;  %2014 = vmatpush1.bf16.msra.mxu1 %v4589_v36  ;;  %v4611_v51 = vld [vmem:[#allocation8 + $0x64] ss:$8 sps:$4 sm:$0xff]   ;;  %v4613_v52 = vld [vmem:[#allocation8 + $0x60] ss:$8 sps:$4 sm:$0xff]   ;;  %v4614_v53 = vld [vmem:[#allocation8 + $0x74] ss:$8 sps:$4 sm:$0xff]  }
 0x126   : > { %1011 = vmatprep.subr.bf16.mxu0 %v4503_v11  ;;  %2015 = vmatprep.subr.bf16.mxu1 %v4593_v39  ;;  %v4616_v54 = vld [vmem:[#allocation8 + $0x70] ss:$8 sps:$4 sm:$0xff]   ;;  %v4548_v56 = vld [vmem:[%s5555_s29 + $0xa4] ss:$8 sps:$4 sm:$0xff]   ;;  %v4623_v59 = vld [vmem:[#allocation8 + $0x94] ss:$8 sps:$4 sm:$0xff]  }
 0x127   : > { %v4620_v57 = vld [vmem:[#allocation8 + $0x84] ss:$8 sps:$4 sm:$0xff]   ;;  %v4622_v58 = vld [vmem:[#allocation8 + $0x80] ss:$8 sps:$4 sm:$0xff]   ;;  %v4625_v60 = vld [vmem:[#allocation8 + $0x90] ss:$8 sps:$4 sm:$0xff]  }
 0x128   : > { %v4626_v61 = vld [vmem:[#allocation8 + $0xa4] ss:$8 sps:$4 sm:$0xff]   ;;  %v4551_v63 = vld [vmem:[%s5555_s29 + $0xb4] ss:$8 sps:$4 sm:$0xff]   ;;  %v4628_v0 = vld [vmem:[#allocation8 + $0xa0] ss:$8 sps:$4 sm:$0xff]  }
 0x129   : > { %1012 = vmatpush1.bf16.msra.mxu0 %v4505_v12  ;;  %2016 = vmatpush1.bf16.msra.mxu1 %v4595_v40  ;;  %v4550_v62 = vld [vmem:[%s5555_s29 + $0xa0] ss:$8 sps:$4 sm:$0xff]   ;;  %v4553_v1 = vld [vmem:[%s5555_s29 + $0xb0] ss:$8 sps:$4 sm:$0xff]   ;;  %v4554_v4 = vld [vmem:[%s5555_s29 + $0xc4] ss:$8 sps:$4 sm:$0xff]  }
 0x12a   : > { %1013 = vmatprep.subr.bf16.mxu0 %v4506_v13  ;;  %2017 = vmatprep.subr.bf16.mxu1 %v4596_v41  ;;  %v4629_v2 = vld [vmem:[#allocation8 + $0xb4] ss:$8 sps:$4 sm:$0xff]   ;;  %v4631_v3 = vld [vmem:[#allocation8 + $0xb0] ss:$8 sps:$4 sm:$0xff]   ;;  %v4632_v5 = vld [vmem:[#allocation8 + $0xc4] ss:$8 sps:$4 sm:$0xff]  }
 0x12b   : > { %v4634_v6 = vld [vmem:[#allocation8 + $0xc0] ss:$8 sps:$4 sm:$0xff]   ;;  %v4635_v7 = vld [vmem:[#allocation8 + $0xd4] ss:$8 sps:$4 sm:$0xff]   ;;  %v4637_v8 = vld [vmem:[#allocation8 + $0xd0] ss:$8 sps:$4 sm:$0xff]  }
 0x12c   : > { %v4556_v9 = vld [vmem:[%s5555_s29 + $0xc0] ss:$8 sps:$4 sm:$0xff]   ;;  %v4557_v10 = vld [vmem:[%s5555_s29 + $0xd4] ss:$8 sps:$4 sm:$0xff]   ;;  %v4590_v33 = vld [vmem:[%s5555_s29 + $0x164] ss:$8 sps:$4 sm:$0xff]  }
 0x12d   : > { %1014 = vmatpush1.bf16.msra.mxu0 %v4508_v14  ;;  %2018 = vmatpush1.bf16.msra.mxu1 %v4598_v42  ;;  %v4638_v11 = vld [vmem:[#allocation8 + $0xe4] ss:$8 sps:$4 sm:$0xff]   ;;  %v4640_v12 = vld [vmem:[#allocation8 + $0xe0] ss:$8 sps:$4 sm:$0xff]   ;;  %v4641_v13 = vld [vmem:[#allocation8 + $0xf4] ss:$8 sps:$4 sm:$0xff]  }
 0x12e   : > { %1015 = vmatprep.subr.bf16.mxu0 %v4509_v15  ;;  %2019 = vmatprep.subr.bf16.mxu1 %v4602_v45  ;;  %v4643_v14 = vld [vmem:[#allocation8 + $0xf0] ss:$8 sps:$4 sm:$0xff]   ;;  %v4592_v34 = vld [vmem:[%s5555_s29 + $0x160] ss:$8 sps:$4 sm:$0xff]   ;;  %v4644_v41 = vld [vmem:[%s5555_s29 + $0x1a4] ss:$8 sps:$4 sm:$0xff]  }
 0x12f   : > { %v4559_v15 = vld [vmem:[%s5555_s29 + $0xd0] ss:$8 sps:$4 sm:$0xff]   ;;  %v4599_v35 = vld [vmem:[%s5555_s29 + $0x174] ss:$8 sps:$4 sm:$0xff]   ;;  %v4650_v42 = vld [vmem:[#allocation8 + $0x100] ss:$8 sps:$4 sm:$0xff]  }
 0x130   : > { %v4601_v36 = vld [vmem:[%s5555_s29 + $0x170] ss:$8 sps:$4 sm:$0xff]   ;;  %v4617_v39 = vld [vmem:[%s5555_s29 + $0x194] ss:$8 sps:$4 sm:$0xff]   ;;  %s484_s23 = scalar_lea.vmem [#allocation17], %s3870_s20  ;;  %s5994_s24 = sld [smem:[#allocation31_spill]] }
 0x131   : > { %1016 = vmatpush1.bf16.msra.mxu0 %v4511_v16  ;;  %2020 = vmatpush1.bf16.msra.mxu1 %v4604_v46  ;;  %v4560_v16 = vld [vmem:[%s5555_s29 + $0xe4] ss:$8 sps:$4 sm:$0xff]   ;;  %v4619_v40 = vld [vmem:[%s5555_s29 + $0x190] ss:$8 sps:$4 sm:$0xff]   ;;  %v4646_v46 = vld [vmem:[%s5555_s29 + $0x1a0] ss:$8 sps:$4 sm:$0xff]  }
 0x132   : > { %1017 = vmatprep.subr.bf16.mxu0 %v4512_v17  ;;  %2021 = vmatprep.subr.bf16.mxu1 %v4605_v47  ;;  %v5232_v17 = vmov 0   ;;  %v4655_v45 = vld [vmem:[#allocation8 + $0x114] ss:$8 sps:$4 sm:$0xff]   ;;  %s3696_s13 = sshll.u32 %s484_s23, 4  ;;  %s4193_s25 = sshll.u32 %s5985_s19, 8  ;;  %s5891_s13 = int_to_ptr.vmem [resolvable:$true] %s3696_s13 }
 0x133   : > { %2043 = vmatprep.mubr.bf16.mxu1 %v5232_v17  ;;  %v4647_v47 = vld [vmem:[%s5555_s29 + $0x1b4] ss:$8 sps:$4 sm:$0xff]   ;;  %s5995_s14 = sld [smem:[#allocation35_spill]]  ;;  %s3683_s28 = scalar_lea.sflag [#allocation4], %s5551_s26 }
 0x134   : > { %s5130_s1 = scalar_lea.vmem %s5891_s13, 256  ;;  %s5233_s30 = smov [#allocation17]  }
 0x135   : > { %1018 = vmatpush1.bf16.msra.mxu0 %v4514_v18  ;;  %2022 = vmatpush1.bf16.msra.mxu1 %v4607_v48  ;;  %v4562_v18 = vld [vmem:[%s5555_s29 + $0xe0] ss:$8 sps:$4 sm:$0xff]   ;;  %p5131_p10 = scmp.ne.s32.totalorder %s5891_s13, %s5130_s1  ;;  %s5134_s18 = sshll.u32 %s5233_s30, 4  ;;  %s5135_s18 = int_to_ptr.vmem [resolvable:$false] %s5134_s18 }
 0x136   : > { %1019 = vmatprep.subr.bf16.mxu0 %v4515_v19  ;;  %2023 = vmatprep.subr.bf16.mxu1 %v4611_v51  ;;  %v4563_v19 = vld [vmem:[%s5555_s29 + $0xf4] ss:$8 sps:$4 sm:$0xff]   ;;  %p5996_p1 = scmp.ne.s32.totalorder %s5994_s24, 0  ;;  %s5136_s15 = scalar_lea.vmem %s5135_s18, 512 }
 0x137   : > { %p5137_p5 = scmp.lt.s32.totalorder %s5891_s13, %s5135_s18  ;;  %p5138_p6 = scmp.lt.s32.totalorder %s5136_s15, %s5130_s1 }
 0x138   : > { %p5132_p3 = pnand %p5131_p10, %p5996_p1 }
 0x139   : > { %1020 = vmatpush1.bf16.msra.mxu0 %v4517_v20  ;;  %2024 = vmatpush1.bf16.msra.mxu1 %v4613_v52  ;;  %v4565_v20 = vld [vmem:[%s5555_s29 + $0xf0] ss:$8 sps:$4 sm:$0xff]   ;;  %s5896_s3 = scalar_lea.hbm %s5995_s14, %s4193_s25  ;;  %p5139_p11 = por %p5138_p6, %p5137_p5 }
 0x13a   : > { %2025 = vmatprep.subr.bf16.mxu1 %v4614_v53  ;;  %p5133_p2 = pneg %p5132_p3 }
 0x13c   : > { %1034 = vmatmul.mubr.bf16.vlgmr.msra.gmra.mrb[0].mxu0 %v4518_v21  ;;  %v4566_v21 = vld [vmem:[%s5555_s29 + $0x104] ss:$8 sps:$4 sm:$0xff]   ;;  %p5140_p12 = pnand %p5139_p11, %p5133_p2 }
 0x13d   : > { %3948 = vmatprep.mubr.msk.bf16.mxu0 %vm916_vm0, %v4521_v22  ;;  %2026 = vmatpush1.bf16.msra.mxu1 %v4616_v54  ;;  %v4568_v22 = vld [vmem:[%s5555_s29 + $0x100] ss:$8 sps:$4 sm:$0xff]  }
 0x13e   : > { %2027 = vmatprep.subr.bf16.mxu1 %v4620_v57  ;;  %v5663_v57 = vld [vmem:[#allocation7] ss:$0 sm:$0xff] }
 0x141   : > { %2028 = vmatpush1.bf16.msra.mxu1 %v4622_v58 }
 0x142   : > { %2029 = vmatprep.subr.bf16.mxu1 %v4623_v59  ;;  %v4659_v59 = vld [vmem:[#allocation8 + $0x130] ss:$8 sps:$4 sm:$0xff]  }
 0x144   : > { %1044 = vmatmul.mubr.bf16.gmra.mrb[4].mxu0 %v4523_v23  ;;  %v4569_v23 = vld [vmem:[%s5555_s29 + $0x114] ss:$8 sps:$4 sm:$0xff]  }
 0x145   : > { %3949 = vmatprep.mubr.msk.bf16.mxu0 %vm916_vm0, %v4524_v24  ;;  %2030 = vmatpush1.bf16.msra.mxu1 %v4625_v60  ;;  %v4571_v24 = vld [vmem:[%s5555_s29 + $0x110] ss:$8 sps:$4 sm:$0xff]  }
 0x146   : > { %2031 = vmatprep.subr.bf16.mxu1 %v4626_v61  ;;  %v4661_v60 = vld [vmem:[#allocation8 + $0x134] ss:$8 sps:$4 sm:$0xff]  }
 0x149   : > { %2032 = vmatpush1.bf16.msra.mxu1 %v4628_v0 }
 0x14a   : > { %2033 = vmatprep.subr.bf16.mxu1 %v4629_v2 }
 0x14c   : > { %1054 = vmatmul.mubr.bf16.gmra.mrb[8].mxu0 %v4526_v25  ;;  %v4572_v25 = vld [vmem:[%s5555_s29 + $0x124] ss:$8 sps:$4 sm:$0xff]  }
 0x14d   : > { %3950 = vmatprep.mubr.msk.bf16.mxu0 %vm916_vm0, %v4527_v26  ;;  %2034 = vmatpush1.bf16.msra.mxu1 %v4631_v3  ;;  %v4574_v26 = vld [vmem:[%s5555_s29 + $0x120] ss:$8 sps:$4 sm:$0xff]  }
 0x14e   : > { %2035 = vmatprep.subr.bf16.mxu1 %v4632_v5 }
 0x151   : > { %2036 = vmatpush1.bf16.msra.mxu1 %v4634_v6 }
 0x152   : > { %2037 = vmatprep.subr.bf16.mxu1 %v4635_v7 }
 0x154   : > { %1064 = vmatmul.mubr.bf16.gmra.mrb[12].mxu0 %v4529_v27  ;;  %v4575_v27 = vld [vmem:[%s5555_s29 + $0x134] ss:$8 sps:$4 sm:$0xff]  }
 0x155   : > { %3951 = vmatprep.mubr.msk.bf16.mxu0 %vm916_vm0, %v4530_v28  ;;  %2038 = vmatpush1.bf16.msra.mxu1 %v4637_v8  ;;  %v4577_v28 = vld [vmem:[%s5555_s29 + $0x130] ss:$8 sps:$4 sm:$0xff]  }
 0x156   : > { %2039 = vmatprep.subr.bf16.mxu1 %v4638_v11 }
 0x159   : > { %2040 = vmatpush1.bf16.msra.mxu1 %v4640_v12  ;;  %v4662_v12 = vld [vmem:[#allocation8 + $0x140] ss:$8 sps:$4 sm:$0xff]  }
 0x15a   : > { %2041 = vmatprep.subr.bf16.mxu1 %v4641_v13  ;;  %v4664_v13 = vld [vmem:[#allocation8 + $0x144] ss:$8 sps:$4 sm:$0xff]  }
 0x15c   : > { %1074 = vmatmul.mubr.bf16.gmra.mrb[16].mxu0 %v4532_v29  ;;  %v4578_v29 = vld [vmem:[%s5555_s29 + $0x144] ss:$8 sps:$4 sm:$0xff]  }
 0x15d   : > { %3952 = vmatprep.mubr.msk.bf16.mxu0 %vm916_vm0, %v4533_v30  ;;  %2042 = vmatpush1.bf16.msra.mxu1 %v4643_v14  ;;  %v4580_v30 = vld [vmem:[%s5555_s29 + $0x140] ss:$8 sps:$4 sm:$0xff]  }
 0x160   : > { %2044 = vmatmul.mubr.bf16.vlgmr.msra.gmra.mrb[0].mxu1 %v5232_v17 }
 0x164   : > { %1084 = vmatmul.mubr.bf16.gmra.mrb[20].mxu0 %v4535_v31  ;;  %v4581_v31 = vld [vmem:[%s5555_s29 + $0x154] ss:$8 sps:$4 sm:$0xff]  }
 0x165   : > { %3953 = vmatprep.mubr.msk.bf16.mxu0 %vm916_vm0, %v4536_v32  ;;  %v4583_v32 = vld [vmem:[%s5555_s29 + $0x150] ss:$8 sps:$4 sm:$0xff]  }
 0x16c   : > { %1094 = vmatmul.mubr.bf16.gmra.mrb[24].mxu0 %v4538_v37  ;;  %v4608_v37 = vld [vmem:[%s5555_s29 + $0x184] ss:$8 sps:$4 sm:$0xff]  }
 0x16d   : > { %3954 = vmatprep.mubr.msk.bf16.mxu0 %vm916_vm0, %v4539_v38  ;;  %v4610_v38 = vld [vmem:[%s5555_s29 + $0x180] ss:$8 sps:$4 sm:$0xff]  }
 0x174   : > { %1104 = vmatmul.mubr.bf16.gmra.mrb[28].mxu0 %v4541_v43  ;;  %v4652_v43 = vld [vmem:[#allocation8 + $0x104] ss:$8 sps:$4 sm:$0xff]  }
 0x175   : > { %3955 = vmatprep.mubr.msk.bf16.mxu0 %vm916_vm0, %v4542_v44  ;;  %2184 = vmatprep.subr.bf16.mxu1 %v4652_v43  ;;  %v4653_v44 = vld [vmem:[#allocation8 + $0x110] ss:$8 sps:$4 sm:$0xff]  }
 0x176   : > { %2185 = vmatpush1.bf16.msra.mxu1 %v4650_v42 }
 0x177   : > { %2186 = vmatprep.subr.bf16.mxu1 %v4655_v45 }
 0x17a   : > { %2187 = vmatpush1.bf16.msra.mxu1 %v4653_v44 }
 0x17c   : > { %1114 = vmatmul.mubr.bf16.gmra.mrb[32].mxu0 %v4544_v49 }
 0x17d   : > { %3956 = vmatprep.mubr.msk.bf16.mxu0 %vm916_vm0, %v4545_v50  ;;  %v4649_v50 = vld [vmem:[%s5555_s29 + $0x1b0] ss:$8 sps:$4 sm:$0xff]  }
 0x184   : > { %1124 = vmatmul.mubr.bf16.gmra.mrb[36].mxu0 %v4547_v55  ;;  %v4656_v55 = vld [vmem:[#allocation8 + $0x120] ss:$8 sps:$4 sm:$0xff]  }
 0x185   : > { %3957 = vmatprep.mubr.msk.bf16.mxu0 %vm916_vm0, %v4548_v56  ;;  %v4658_v56 = vld [vmem:[#allocation8 + $0x124] ss:$8 sps:$4 sm:$0xff]  }
 0x186   : > { %2188 = vmatprep.subr.bf16.mxu1 %v4658_v56 }
 0x187   : > { %2189 = vmatpush1.bf16.msra.mxu1 %v4656_v55 }
 0x188   : > { %2190 = vmatprep.subr.bf16.mxu1 %v4661_v60 }
 0x18b   : > { %2191 = vmatpush1.bf16.msra.mxu1 %v4659_v59 }
 0x18c   : > { %1134 = vmatmul.mubr.bf16.gmra.mrb[40].mxu0 %v4550_v62  ;;  %2192 = vmatprep.subr.bf16.mxu1 %v4664_v13  ;;  %v4677_v13 = vld [vmem:[#allocation8 + $0x190] ss:$8 sps:$4 sm:$0xff]  }
 0x18d   : > { %3958 = vmatprep.mubr.msk.bf16.mxu0 %vm916_vm0, %v4551_v63 }
 0x18f   : > { %2193 = vmatpush1.bf16.msra.mxu1 %v4662_v12 }
 0x194   : > { %1144 = vmatmul.mubr.bf16.gmra.mrb[44].mxu0 %v4553_v1 }
 0x195   : > { %3959 = vmatprep.mubr.msk.bf16.mxu0 %vm916_vm0, %v4554_v4 }
 0x19c   : > { %1154 = vmatmul.mubr.bf16.gmra.mrb[48].mxu0 %v4556_v9 }
 0x19d   : > { %3960 = vmatprep.mubr.msk.bf16.mxu0 %vm916_vm0, %v4557_v10 }
 0x1a4   : > { %1164 = vmatmul.mubr.bf16.gmra.mrb[52].mxu0 %v4559_v15 }
 0x1a5   : > { %3961 = vmatprep.mubr.msk.bf16.mxu0 %vm916_vm0, %v4560_v16 }
 0x1ac   : > { %1174 = vmatmul.mubr.bf16.gmra.mrb[56].mxu0 %v4562_v18 }
 0x1ad   : > { %3962 = vmatprep.mubr.msk.bf16.mxu0 %vm916_vm0, %v4563_v19 }
 0x1b4   : > { %1184 = vmatmul.mubr.bf16.gmra.mrb[60].mxu0 %v4565_v20 }
 0x1b5   : > { %3963 = vmatprep.mubr.msk.bf16.mxu0 %vm916_vm0, %v4566_v21 }
 0x1bc   : > { %1194 = vmatmul.mubr.bf16.gmra.mrb[64].mxu0 %v4568_v22  ;;  %v4665_v22 = vld [vmem:[#allocation8 + $0x150] ss:$8 sps:$4 sm:$0xff]  }
 0x1bd   : > { %3964 = vmatprep.mubr.msk.bf16.mxu0 %vm916_vm0, %v4569_v23  ;;  %v4667_v23 = vld [vmem:[#allocation8 + $0x154] ss:$8 sps:$4 sm:$0xff]  }
 0x1be   : > { %2194 = vmatprep.subr.bf16.mxu1 %v4667_v23 }
 0x1bf   : > { %2195 = vmatpush1.bf16.msra.mxu1 %v4665_v22 }
 0x1c4   : > { %1204 = vmatmul.mubr.bf16.gmra.mrb[68].mxu0 %v4571_v24 }
 0x1c5   : > { %3965 = vmatprep.mubr.msk.bf16.mxu0 %vm916_vm0, %v4572_v25  ;;  %v4670_v25 = vld [vmem:[#allocation8 + $0x164] ss:$8 sps:$4 sm:$0xff]  }
 0x1c6   : > { %2196 = vmatprep.subr.bf16.mxu1 %v4670_v25 }
 0x1cc   : > { %1214 = vmatmul.mubr.bf16.gmra.mrb[72].mxu0 %v4574_v26 }
 0x1cd   : > { %3966 = vmatprep.mubr.msk.bf16.mxu0 %vm916_vm0, %v4575_v27  ;;  %v4668_v27 = vld [vmem:[#allocation8 + $0x160] ss:$8 sps:$4 sm:$0xff]  }
 0x1ce   : > { %2197 = vmatpush1.bf16.msra.mxu1 %v4668_v27 }
 0x1d4   : > { %1224 = vmatmul.mubr.bf16.gmra.mrb[76].mxu0 %v4577_v28 }
 0x1d5   : > { %3967 = vmatprep.mubr.msk.bf16.mxu0 %vm916_vm0, %v4578_v29 }
 0x1dc   : > { %1234 = vmatmul.mubr.bf16.gmra.mrb[80].mxu0 %v4580_v30 }
 0x1dd   : > { %3968 = vmatprep.mubr.msk.bf16.mxu0 %vm916_vm0, %v4581_v31 }
 0x1e4   : > { %1244 = vmatmul.mubr.bf16.gmra.mrb[84].mxu0 %v4583_v32 }
 0x1e5   : > { %3969 = vmatprep.mubr.msk.bf16.mxu0 %vm916_vm0, %v4590_v33 }
 0x1ec   : > { %1254 = vmatmul.mubr.bf16.gmra.mrb[88].mxu0 %v4592_v34 }
 0x1ed   : > { %3970 = vmatprep.mubr.msk.bf16.mxu0 %vm916_vm0, %v4599_v35 }
 0x1f4   : > { %1264 = vmatmul.mubr.bf16.gmra.mrb[92].mxu0 %v4601_v36 }
 0x1f5   : > { %3971 = vmatprep.mubr.msk.bf16.mxu0 %vm916_vm0, %v4608_v37 }
 0x1fc   : > { %1274 = vmatmul.mubr.bf16.gmra.mrb[96].mxu0 %v4610_v38 }
 0x1fd   : > { %3972 = vmatprep.mubr.msk.bf16.mxu0 %vm916_vm0, %v4617_v39 }
 0x204   : > { %1284 = vmatmul.mubr.bf16.gmra.mrb[100].mxu0 %v4619_v40 }
 0x205   : > { %3973 = vmatprep.mubr.msk.bf16.mxu0 %vm916_vm0, %v4644_v41 }
 0x20c   : > { %1294 = vmatmul.mubr.bf16.gmra.mrb[104].mxu0 %v4646_v46 }
 0x20d   : > { %3974 = vmatprep.mubr.msk.bf16.mxu0 %vm916_vm0, %v4647_v47 }
 0x20f   : > { %v1035_v48 = vpop.f32.mrb[0].mxu0 }
 0x210   : > { %v1037_v49 = vpop.f32.mrb[1].mxu0 }
 0x211   : > { %v1314_v51 = vmax.f32 %v1035_v48, %v1037_v49  ;;  %v1039_v52 = vpop.f32.mrb[2].mxu0  ;;  %v4671_v49 = vld [vmem:[#allocation8 + $0x170] ss:$8 sps:$4 sm:$0xff]  }
 0x212   : > { %v1041_v53 = vpop.f32.mrb[3].mxu0 }
 0x213   : > { %v1315_v54 = vmax.f32 %v1039_v52, %v1041_v53  ;;  %v1377_v62 = vadd.f32 %v5663_v57, %v1314_v51  ;;  %v4674_v52 = vld [vmem:[#allocation8 + $0x180] ss:$8 sps:$4 sm:$0xff]   ;;  %v4676_v53 = vld [vmem:[#allocation8 + $0x184] ss:$8 sps:$4 sm:$0xff]  }
 0x214   : > { %1304 = vmatmul.mubr.bf16.gmra.mrb[108].mxu0 %v4649_v50  ;;  %v4673_v50 = vld [vmem:[#allocation8 + $0x174] ss:$8 sps:$4 sm:$0xff]  }
 0x215   : > { %v1378_v1 = vadd.f32 %v5663_v57, %v1315_v54  ;;  %v1433_v5 = vmax.f32 %v1377_v62, 0.0  ;;  %2198 = vmatprep.subr.bf16.mxu1 %v4673_v50 }
 0x216   : > { %2199 = vmatpush1.bf16.msra.mxu1 %v4671_v49 }
 0x217   : > { %v1045_v58 = vpop.f32.mrb[4].mxu0  ;;  %v1434_v8 = vmax.f32 %v1378_v1, 0.0  ;;  %2200 = vmatprep.subr.bf16.mxu1 %v4676_v53 }
 0x218   : > { %v1047_v61 = vpop.f32.mrb[5].mxu0 }
 0x219   : > { %v1316_v63 = vmax.f32 %v1045_v58, %v1047_v61  ;;  %v1049_v0 = vpop.f32.mrb[6].mxu0 }
 0x21a   : > { %v1051_v2 = vpop.f32.mrb[7].mxu0  ;;  %2201 = vmatpush1.bf16.msra.mxu1 %v4674_v52 }
 0x21b   : > { %v1379_v3 = vadd.f32 %v5663_v57, %v1316_v63  ;;  %v1317_v4 = vmax.f32 %v1049_v0, %v1051_v2 }
 0x21d   : > { %v1435_v6 = vmax.f32 %v1379_v3, 0.0  ;;  %v1380_v7 = vadd.f32 %v5663_v57, %v1317_v4 }
 0x21f   : > { %v1489_v9 = vmax.f32 %v1433_v5, %v1435_v6  ;;  %v1436_v10 = vmax.f32 %v1380_v7, 0.0  ;;  %v1055_v11 = vpop.f32.mrb[8].mxu0 }
 0x220   : > { %v1057_v14 = vpop.f32.mrb[9].mxu0 }
 0x221   : > { %v1490_v15 = vmax.f32 %v1434_v8, %v1436_v10  ;;  %v1318_v16 = vmax.f32 %v1055_v11, %v1057_v14  ;;  %v1059_v18 = vpop.f32.mrb[10].mxu0  ;;  %v4679_v14 = vld [vmem:[#allocation8 + $0x194] ss:$8 sps:$4 sm:$0xff]  }
 0x222   : > { %v1061_v19 = vpop.f32.mrb[11].mxu0  ;;  %2202 = vmatprep.subr.bf16.mxu1 %v4679_v14  ;;  %v4695_v14 = vld [vmem:[#allocation8 + $0x1f0] ss:$8 sps:$4 sm:$0xff]  }
 0x223   : > { %v1319_v20 = vmax.f32 %v1059_v18, %v1061_v19  ;;  %v5669_v21 = vpack.c.bf16 %v1490_v15, %v1489_v9  ;;  %v1381_v28 = vadd.f32 %v5663_v57, %v1318_v16  ;;  %2203 = vmatpush1.bf16.msra.mxu1 %v4677_v13  ;;  %v4680_v16 = vld [vmem:[#allocation8 + $0x1a0] ss:$8 sps:$4 sm:$0xff]   ;;  %v4682_v18 = vld [vmem:[#allocation8 + $0x1a4] ss:$8 sps:$4 sm:$0xff]  }
 0x224   : > { %2204 = vmatprep.subr.bf16.mxu1 %v4682_v18 }
 0x225   : > { %2053 = vmatprep.mubr.bf16.mxu1 %v5669_v21  ;;  %v1382_v32 = vadd.f32 %v5663_v57, %v1319_v20  ;;  %v1437_v35 = vmax.f32 %v1381_v28, 0.0 }
 0x226   : > { %2054 = vmatmul.mubr.bf16.gmra.mrb[4].mxu1 %v5232_v17 }
 0x227   : > { %v1065_v24 = vpop.f32.mrb[12].mxu0  ;;  %v1438_v38 = vmax.f32 %v1382_v32, 0.0  ;;  %2205 = vmatpush1.bf16.msra.mxu1 %v4680_v16  ;;  %v4700_v16 = vld [vmem:[#allocation8 + $0x204] ss:$8 sps:$4 sm:$0xff]  }
 0x228   : > { %v1067_v26 = vpop.f32.mrb[13].mxu0 }
 0x229   : > { %v1320_v29 = vmax.f32 %v1065_v24, %v1067_v26  ;;  %v1069_v30 = vpop.f32.mrb[14].mxu0 }
 0x22a   : > { %v1071_v31 = vpop.f32.mrb[15].mxu0 }
 0x22b   : > { %v1383_v33 = vadd.f32 %v5663_v57, %v1320_v29  ;;  %v1321_v34 = vmax.f32 %v1069_v30, %v1071_v31 }
 0x22d   : > { %v1439_v36 = vmax.f32 %v1383_v33, 0.0  ;;  %v1384_v37 = vadd.f32 %v5663_v57, %v1321_v34 }
 0x22f   : > { %v1491_v39 = vmax.f32 %v1437_v35, %v1439_v36  ;;  %v1440_v40 = vmax.f32 %v1384_v37, 0.0  ;;  %v1075_v41 = vpop.f32.mrb[16].mxu0 }
 0x230   : > { %v1077_v42 = vpop.f32.mrb[17].mxu0 }
 0x231   : > { %v1492_v43 = vmax.f32 %v1438_v38, %v1440_v40  ;;  %v1322_v44 = vmax.f32 %v1075_v41, %v1077_v42  ;;  %v1079_v45 = vpop.f32.mrb[18].mxu0  ;;  %v4683_v42 = vld [vmem:[#allocation8 + $0x1b0] ss:$8 sps:$4 sm:$0xff]  }
 0x232   : > { %v1081_v46 = vpop.f32.mrb[19].mxu0 }
 0x233   : > { %v5677_v47 = vpack.c.bf16 %v1492_v43, %v1491_v39  ;;  %v1323_v48 = vmax.f32 %v1079_v45, %v1081_v46  ;;  %v1385_v55 = vadd.f32 %v5663_v57, %v1322_v44  ;;  %v4685_v43 = vld [vmem:[#allocation8 + $0x1b4] ss:$8 sps:$4 sm:$0xff]   ;;  %v4688_v44 = vld [vmem:[#allocation8 + $0x1c4] ss:$8 sps:$4 sm:$0xff]   ;;  %v4686_v46 = vld [vmem:[#allocation8 + $0x1c0] ss:$8 sps:$4 sm:$0xff]  }
 0x234   : > { %2206 = vmatprep.subr.bf16.mxu1 %v4685_v43 }
 0x235   : > { %2063 = vmatprep.mubr.bf16.mxu1 %v5677_v47  ;;  %v1386_v60 = vadd.f32 %v5663_v57, %v1323_v48  ;;  %v1441_v63 = vmax.f32 %v1385_v55, 0.0  ;;  %2207 = vmatpush1.bf16.msra.mxu1 %v4683_v42 }
 0x236   : > { %2064 = vmatmul.mubr.bf16.gmra.mrb[8].mxu1 %v5669_v21  ;;  %2208 = vmatprep.subr.bf16.mxu1 %v4688_v44 }
 0x237   : > { %v1085_v51 = vpop.f32.mrb[20].mxu0  ;;  %v1442_v2 = vmax.f32 %v1386_v60, 0.0 }
 0x238   : > { %v1087_v54 = vpop.f32.mrb[21].mxu0 }
 0x239   : > { %v1324_v56 = vmax.f32 %v1085_v51, %v1087_v54  ;;  %v1089_v58 = vpop.f32.mrb[22].mxu0  ;;  %2209 = vmatpush1.bf16.msra.mxu1 %v4686_v46 }
 0x23a   : > { %v1091_v59 = vpop.f32.mrb[23].mxu0 }
 0x23b   : > { %v1387_v61 = vadd.f32 %v5663_v57, %v1324_v56  ;;  %v1325_v62 = vmax.f32 %v1089_v58, %v1091_v59 }
 0x23d   : > { %v1443_v0 = vmax.f32 %v1387_v61, 0.0  ;;  %v1388_v1 = vadd.f32 %v5663_v57, %v1325_v62 }
 0x23f   : > { %v1493_v3 = vmax.f32 %v1441_v63, %v1443_v0  ;;  %v1444_v4 = vmax.f32 %v1388_v1, 0.0  ;;  %v1095_v5 = vpop.f32.mrb[24].mxu0  ;;  %v4689_v0 = vld [vmem:[#allocation8 + $0x1d0] ss:$8 sps:$4 sm:$0xff]   ;;  %v4691_v1 = vld [vmem:[#allocation8 + $0x1d4] ss:$8 sps:$4 sm:$0xff]  }
 0x240   : > { %v1097_v6 = vpop.f32.mrb[25].mxu0  ;;  %2210 = vmatprep.subr.bf16.mxu1 %v4691_v1 }
 0x241   : > { %v1494_v7 = vmax.f32 %v1442_v2, %v1444_v4  ;;  %v1326_v8 = vmax.f32 %v1095_v5, %v1097_v6  ;;  %v1099_v9 = vpop.f32.mrb[26].mxu0  ;;  %2211 = vmatpush1.bf16.msra.mxu1 %v4689_v0 }
 0x242   : > { %v1101_v10 = vpop.f32.mrb[27].mxu0 }
 0x243   : > { %v5685_v11 = vpack.c.bf16 %v1494_v7, %v1493_v3  ;;  %v1327_v12 = vmax.f32 %v1099_v9, %v1101_v10  ;;  %v1389_v20 = vadd.f32 %v5663_v57, %v1326_v8  ;;  %v4692_v9 = vld [vmem:[#allocation8 + $0x1e0] ss:$8 sps:$4 sm:$0xff]   ;;  %v4694_v10 = vld [vmem:[#allocation8 + $0x1e4] ss:$8 sps:$4 sm:$0xff]  }
 0x244   : > { %2212 = vmatprep.subr.bf16.mxu1 %v4694_v10 }
 0x245   : > { %2073 = vmatprep.mubr.bf16.mxu1 %v5685_v11  ;;  %v1390_v25 = vadd.f32 %v5663_v57, %v1327_v12  ;;  %v1445_v28 = vmax.f32 %v1389_v20, 0.0  ;;  %v4697_v12 = vld [vmem:[#allocation8 + $0x1f4] ss:$8 sps:$4 sm:$0xff]   ;;  %2213 = vmatpush1.bf16.msra.mxu1 %v4692_v9 }
 0x246   : > { %2074 = vmatmul.mubr.bf16.gmra.mrb[12].mxu1 %v5677_v47  ;;  %2214 = vmatprep.subr.bf16.mxu1 %v4697_v12 }
 0x247   : > { %v1105_v15 = vpop.f32.mrb[28].mxu0  ;;  %v1446_v31 = vmax.f32 %v1390_v25, 0.0 }
 0x248   : > { %v1107_v19 = vpop.f32.mrb[29].mxu0 }
 0x249   : > { %v1328_v22 = vmax.f32 %v1105_v15, %v1107_v19  ;;  %v1109_v23 = vpop.f32.mrb[30].mxu0  ;;  %2215 = vmatpush1.bf16.msra.mxu1 %v4695_v14 }
 0x24a   : > { %v1111_v24 = vpop.f32.mrb[31].mxu0  ;;  %2357 = vmatprep.subr.bf16.mxu1 %v4700_v16 }
 0x24b   : > { %v1391_v26 = vadd.f32 %v5663_v57, %v1328_v22  ;;  %v1329_v27 = vmax.f32 %v1109_v23, %v1111_v24 }
 0x24d   : > { %v1447_v29 = vmax.f32 %v1391_v26, 0.0  ;;  %v1392_v30 = vadd.f32 %v5663_v57, %v1329_v27 }
 0x24f   : > { %v1495_v32 = vmax.f32 %v1445_v28, %v1447_v29  ;;  %v1448_v33 = vmax.f32 %v1392_v30, 0.0  ;;  %v1115_v34 = vpop.f32.mrb[32].mxu0 }
 0x250   : > { %v1117_v35 = vpop.f32.mrb[33].mxu0 }
 0x251   : > { %v1496_v36 = vmax.f32 %v1446_v31, %v1448_v33  ;;  %v1330_v37 = vmax.f32 %v1115_v34, %v1117_v35  ;;  %v1119_v38 = vpop.f32.mrb[34].mxu0 }
 0x252   : > { %v1121_v39 = vpop.f32.mrb[35].mxu0 }
 0x253   : > { %v5693_v40 = vpack.c.bf16 %v1496_v36, %v1495_v32  ;;  %v1331_v41 = vmax.f32 %v1119_v38, %v1121_v39  ;;  %v1393_v49 = vadd.f32 %v5663_v57, %v1330_v37 }
 0x255   : > { %2083 = vmatprep.mubr.bf16.mxu1 %v5693_v40  ;;  %v1394_v52 = vadd.f32 %v5663_v57, %v1331_v41  ;;  %v1449_v56 = vmax.f32 %v1393_v49, 0.0 }
 0x256   : > { %2084 = vmatmul.mubr.bf16.gmra.mrb[16].mxu1 %v5685_v11 }
 0x257   : > { %v1125_v45 = vpop.f32.mrb[36].mxu0  ;;  %v1450_v60 = vmax.f32 %v1394_v52, 0.0 }
 0x258   : > { %v1127_v48 = vpop.f32.mrb[37].mxu0 }
 0x259   : > { %v1332_v50 = vmax.f32 %v1125_v45, %v1127_v48  ;;  %v1129_v51 = vpop.f32.mrb[38].mxu0 }
 0x25a   : > { %v1131_v53 = vpop.f32.mrb[39].mxu0 }
 0x25b   : > { %v1395_v54 = vadd.f32 %v5663_v57, %v1332_v50  ;;  %v1333_v55 = vmax.f32 %v1129_v51, %v1131_v53 }
 0x25d   : > { %v1451_v58 = vmax.f32 %v1395_v54, 0.0  ;;  %v1396_v59 = vadd.f32 %v5663_v57, %v1333_v55 }
 0x25f   : > { %v1497_v61 = vmax.f32 %v1449_v56, %v1451_v58  ;;  %v1452_v62 = vmax.f32 %v1396_v59, 0.0  ;;  %v1135_v63 = vpop.f32.mrb[40].mxu0 }
 0x260   : > { %v1137_v2 = vpop.f32.mrb[41].mxu0 }
 0x261   : > { %v1498_v3 = vmax.f32 %v1450_v60, %v1452_v62  ;;  %v1334_v4 = vmax.f32 %v1135_v63, %v1137_v2  ;;  %v1139_v5 = vpop.f32.mrb[42].mxu0 }
 0x262   : > { %v1141_v6 = vpop.f32.mrb[43].mxu0 }
 0x263   : > { %v5701_v7 = vpack.c.bf16 %v1498_v3, %v1497_v61  ;;  %v1335_v8 = vmax.f32 %v1139_v5, %v1141_v6  ;;  %v1397_v18 = vadd.f32 %v5663_v57, %v1334_v4 }
 0x265   : > { %2093 = vmatprep.mubr.bf16.mxu1 %v5701_v7  ;;  %v1398_v23 = vadd.f32 %v5663_v57, %v1335_v8  ;;  %v1453_v26 = vmax.f32 %v1397_v18, 0.0 }
 0x266   : > { %2094 = vmatmul.mubr.bf16.gmra.mrb[20].mxu1 %v5693_v40 }
 0x267   : > { %v1145_v13 = vpop.f32.mrb[44].mxu0  ;;  %v1454_v29 = vmax.f32 %v1398_v23, 0.0 }
 0x268   : > { %v1147_v15 = vpop.f32.mrb[45].mxu0 }
 0x269   : > { %v1336_v19 = vmax.f32 %v1145_v13, %v1147_v15  ;;  %v1149_v20 = vpop.f32.mrb[46].mxu0 }
 0x26a   : > { %v1151_v22 = vpop.f32.mrb[47].mxu0 }
 0x26b   : > { %v1399_v24 = vadd.f32 %v5663_v57, %v1336_v19  ;;  %v1337_v25 = vmax.f32 %v1149_v20, %v1151_v22 }
 0x26d   : > { %v1455_v27 = vmax.f32 %v1399_v24, 0.0  ;;  %v1400_v28 = vadd.f32 %v5663_v57, %v1337_v25 }
 0x26f   : > { %v1499_v30 = vmax.f32 %v1453_v26, %v1455_v27  ;;  %v1456_v31 = vmax.f32 %v1400_v28, 0.0  ;;  %v1155_v32 = vpop.f32.mrb[48].mxu0 }
 0x270   : > { %v1157_v33 = vpop.f32.mrb[49].mxu0 }
 0x271   : > { %v1500_v34 = vmax.f32 %v1454_v29, %v1456_v31  ;;  %v1338_v35 = vmax.f32 %v1155_v32, %v1157_v33  ;;  %v1159_v36 = vpop.f32.mrb[50].mxu0 }
 0x272   : > { %v1161_v37 = vpop.f32.mrb[51].mxu0 }
 0x273   : > { %v5709_v38 = vpack.c.bf16 %v1500_v34, %v1499_v30  ;;  %v1339_v39 = vmax.f32 %v1159_v36, %v1161_v37  ;;  %v1401_v43 = vadd.f32 %v5663_v57, %v1338_v35 }
 0x275   : > { %2103 = vmatprep.mubr.bf16.mxu1 %v5709_v38  ;;  %v1402_v48 = vadd.f32 %v5663_v57, %v1339_v39  ;;  %v1457_v51 = vmax.f32 %v1401_v43, 0.0 }
 0x276   : > { %2104 = vmatmul.mubr.bf16.gmra.mrb[24].mxu1 %v5701_v7 }
 0x277   : > { %v1165_v41 = vpop.f32.mrb[52].mxu0  ;;  %v1458_v54 = vmax.f32 %v1402_v48, 0.0 }
 0x278   : > { %v1167_v42 = vpop.f32.mrb[53].mxu0 }
 0x279   : > { %v1340_v44 = vmax.f32 %v1165_v41, %v1167_v42  ;;  %v1169_v45 = vpop.f32.mrb[54].mxu0 }
 0x27a   : > { %v1171_v46 = vpop.f32.mrb[55].mxu0 }
 0x27b   : > { %v1403_v49 = vadd.f32 %v5663_v57, %v1340_v44  ;;  %v1341_v50 = vmax.f32 %v1169_v45, %v1171_v46 }
 0x27d   : > { %v1459_v52 = vmax.f32 %v1403_v49, 0.0  ;;  %v1404_v53 = vadd.f32 %v5663_v57, %v1341_v50 }
 0x27f   : > { %v1501_v55 = vmax.f32 %v1457_v51, %v1459_v52  ;;  %v1460_v56 = vmax.f32 %v1404_v53, 0.0  ;;  %v1175_v58 = vpop.f32.mrb[56].mxu0 }
 0x280   : > { %v1177_v59 = vpop.f32.mrb[57].mxu0 }
 0x281   : > { %v1502_v60 = vmax.f32 %v1458_v54, %v1460_v56  ;;  %v1342_v61 = vmax.f32 %v1175_v58, %v1177_v59  ;;  %v1179_v62 = vpop.f32.mrb[58].mxu0 }
 0x282   : > { %v1181_v63 = vpop.f32.mrb[59].mxu0 }
 0x283   : > { %v5717_v0 = vpack.c.bf16 %v1502_v60, %v1501_v55  ;;  %v1343_v1 = vmax.f32 %v1179_v62, %v1181_v63  ;;  %v1405_v4 = vadd.f32 %v5663_v57, %v1342_v61 }
 0x285   : > { %2113 = vmatprep.mubr.bf16.mxu1 %v5717_v0  ;;  %v1406_v9 = vadd.f32 %v5663_v57, %v1343_v1  ;;  %v1461_v13 = vmax.f32 %v1405_v4, 0.0 }
 0x286   : > { %2114 = vmatmul.mubr.bf16.gmra.mrb[28].mxu1 %v5709_v38 }
 0x287   : > { %v1185_v2 = vpop.f32.mrb[60].mxu0  ;;  %v1462_v16 = vmax.f32 %v1406_v9, 0.0 }
 0x288   : > { %v1187_v3 = vpop.f32.mrb[61].mxu0 }
 0x289   : > { %v1344_v5 = vmax.f32 %v1185_v2, %v1187_v3  ;;  %v1189_v6 = vpop.f32.mrb[62].mxu0 }
 0x28a   : > { %v1191_v8 = vpop.f32.mrb[63].mxu0 }
 0x28b   : > { %v1407_v10 = vadd.f32 %v5663_v57, %v1344_v5  ;;  %v1345_v12 = vmax.f32 %v1189_v6, %v1191_v8 }
 0x28d   : > { %v1463_v14 = vmax.f32 %v1407_v10, 0.0  ;;  %v1408_v15 = vadd.f32 %v5663_v57, %v1345_v12 }
 0x28f   : > { %v1503_v18 = vmax.f32 %v1461_v13, %v1463_v14  ;;  %v1464_v19 = vmax.f32 %v1408_v15, 0.0  ;;  %v1195_v20 = vpop.f32.mrb[64].mxu0 }
 0x290   : > { %v1197_v22 = vpop.f32.mrb[65].mxu0 }
 0x291   : > { %v1504_v23 = vmax.f32 %v1462_v16, %v1464_v19  ;;  %v1346_v24 = vmax.f32 %v1195_v20, %v1197_v22  ;;  %v1199_v25 = vpop.f32.mrb[66].mxu0 }
 0x292   : > { %v1201_v26 = vpop.f32.mrb[67].mxu0 }
 0x293   : > { %v5725_v27 = vpack.c.bf16 %v1504_v23, %v1503_v18  ;;  %v1347_v28 = vmax.f32 %v1199_v25, %v1201_v26  ;;  %v1409_v31 = vadd.f32 %v5663_v57, %v1346_v24 }
 0x295   : > { %2123 = vmatprep.mubr.bf16.mxu1 %v5725_v27  ;;  %v1410_v35 = vadd.f32 %v5663_v57, %v1347_v28  ;;  %v1465_v39 = vmax.f32 %v1409_v31, 0.0 }
 0x296   : > { %2124 = vmatmul.mubr.bf16.gmra.mrb[32].mxu1 %v5717_v0 }
 0x297   : > { %v1205_v29 = vpop.f32.mrb[68].mxu0  ;;  %v1466_v43 = vmax.f32 %v1410_v35, 0.0 }
 0x298   : > { %v1207_v30 = vpop.f32.mrb[69].mxu0 }
 0x299   : > { %v1348_v32 = vmax.f32 %v1205_v29, %v1207_v30  ;;  %v1209_v33 = vpop.f32.mrb[70].mxu0 }
 0x29a   : > { %v1211_v34 = vpop.f32.mrb[71].mxu0 }
 0x29b   : > { %v1411_v36 = vadd.f32 %v5663_v57, %v1348_v32  ;;  %v1349_v37 = vmax.f32 %v1209_v33, %v1211_v34 }
 0x29d   : > { %v1467_v41 = vmax.f32 %v1411_v36, 0.0  ;;  %v1412_v42 = vadd.f32 %v5663_v57, %v1349_v37 }
 0x29f   : > { %v1505_v44 = vmax.f32 %v1465_v39, %v1467_v41  ;;  %v1468_v45 = vmax.f32 %v1412_v42, 0.0  ;;  %v1215_v46 = vpop.f32.mrb[72].mxu0 }
 0x2a0   : > { %v1217_v48 = vpop.f32.mrb[73].mxu0 }
 0x2a1   : > { %v1506_v49 = vmax.f32 %v1466_v43, %v1468_v45  ;;  %v1350_v50 = vmax.f32 %v1215_v46, %v1217_v48  ;;  %v1219_v51 = vpop.f32.mrb[74].mxu0 }
 0x2a2   : > { %v1221_v52 = vpop.f32.mrb[75].mxu0 }
 0x2a3   : > { %v5733_v53 = vpack.c.bf16 %v1506_v49, %v1505_v44  ;;  %v1351_v54 = vmax.f32 %v1219_v51, %v1221_v52  ;;  %v1413_v58 = vadd.f32 %v5663_v57, %v1350_v50 }
 0x2a5   : > { %2133 = vmatprep.mubr.bf16.mxu1 %v5733_v53  ;;  %v1414_v62 = vadd.f32 %v5663_v57, %v1351_v54  ;;  %v1469_v2 = vmax.f32 %v1413_v58, 0.0 }
 0x2a6   : > { %2134 = vmatmul.mubr.bf16.gmra.mrb[36].mxu1 %v5725_v27 }
 0x2a7   : > { %v1225_v55 = vpop.f32.mrb[76].mxu0  ;;  %v1470_v5 = vmax.f32 %v1414_v62, 0.0 }
 0x2a8   : > { %v1227_v56 = vpop.f32.mrb[77].mxu0 }
 0x2a9   : > { %v1352_v59 = vmax.f32 %v1225_v55, %v1227_v56  ;;  %v1229_v60 = vpop.f32.mrb[78].mxu0 }
 0x2aa   : > { %v1231_v61 = vpop.f32.mrb[79].mxu0 }
 0x2ab   : > { %v1415_v63 = vadd.f32 %v5663_v57, %v1352_v59  ;;  %v1353_v1 = vmax.f32 %v1229_v60, %v1231_v61 }
 0x2ad   : > { %v1471_v3 = vmax.f32 %v1415_v63, 0.0  ;;  %v1416_v4 = vadd.f32 %v5663_v57, %v1353_v1 }
 0x2af   : > { %v1507_v6 = vmax.f32 %v1469_v2, %v1471_v3  ;;  %v1472_v8 = vmax.f32 %v1416_v4, 0.0  ;;  %v1235_v9 = vpop.f32.mrb[80].mxu0 }
 0x2b0   : > { %v1237_v10 = vpop.f32.mrb[81].mxu0 }
 0x2b1   : > { %v1508_v12 = vmax.f32 %v1470_v5, %v1472_v8  ;;  %v1354_v13 = vmax.f32 %v1235_v9, %v1237_v10  ;;  %v1239_v14 = vpop.f32.mrb[82].mxu0 }
 0x2b2   : > { %v1241_v15 = vpop.f32.mrb[83].mxu0 }
 0x2b3   : > { %v5741_v16 = vpack.c.bf16 %v1508_v12, %v1507_v6  ;;  %v1355_v18 = vmax.f32 %v1239_v14, %v1241_v15  ;;  %v1417_v22 = vadd.f32 %v5663_v57, %v1354_v13 }
 0x2b5   : > { %2143 = vmatprep.mubr.bf16.mxu1 %v5741_v16  ;;  %v1418_v26 = vadd.f32 %v5663_v57, %v1355_v18  ;;  %v1473_v30 = vmax.f32 %v1417_v22, 0.0 }
 0x2b6   : > { %2144 = vmatmul.mubr.bf16.gmra.mrb[40].mxu1 %v5733_v53 }
 0x2b7   : > { %v1245_v19 = vpop.f32.mrb[84].mxu0  ;;  %v1474_v33 = vmax.f32 %v1418_v26, 0.0 }
 0x2b8   : > { %v1247_v20 = vpop.f32.mrb[85].mxu0 }
 0x2b9   : > { %v1356_v23 = vmax.f32 %v1245_v19, %v1247_v20  ;;  %v1249_v24 = vpop.f32.mrb[86].mxu0 }
 0x2ba   : > { %v1251_v25 = vpop.f32.mrb[87].mxu0 }
 0x2bb   : > { %v1419_v28 = vadd.f32 %v5663_v57, %v1356_v23  ;;  %v1357_v29 = vmax.f32 %v1249_v24, %v1251_v25 }
 0x2bd   : > { %v1475_v31 = vmax.f32 %v1419_v28, 0.0  ;;  %v1420_v32 = vadd.f32 %v5663_v57, %v1357_v29 }
 0x2bf   : > { %v1509_v34 = vmax.f32 %v1473_v30, %v1475_v31  ;;  %v1476_v35 = vmax.f32 %v1420_v32, 0.0  ;;  %v1255_v36 = vpop.f32.mrb[88].mxu0 }
 0x2c0   : > { %v1257_v37 = vpop.f32.mrb[89].mxu0 }
 0x2c1   : > { %v1510_v39 = vmax.f32 %v1474_v33, %v1476_v35  ;;  %v1358_v41 = vmax.f32 %v1255_v36, %v1257_v37  ;;  %v1259_v42 = vpop.f32.mrb[90].mxu0 }
 0x2c2   : > { %v1261_v43 = vpop.f32.mrb[91].mxu0 }
 0x2c3   : > { %v5749_v44 = vpack.c.bf16 %v1510_v39, %v1509_v34  ;;  %v1359_v45 = vmax.f32 %v1259_v42, %v1261_v43  ;;  %v1421_v49 = vadd.f32 %v5663_v57, %v1358_v41 }
 0x2c5   : > { %2153 = vmatprep.mubr.bf16.mxu1 %v5749_v44  ;;  %v1422_v54 = vadd.f32 %v5663_v57, %v1359_v45  ;;  %v1477_v58 = vmax.f32 %v1421_v49, 0.0  ;;  %v4698_v49 = vld [vmem:[#allocation8 + $0x200] ss:$8 sps:$4 sm:$0xff]  }
 0x2c6   : > { %2154 = vmatmul.mubr.bf16.gmra.mrb[44].mxu1 %v5741_v16 }
 0x2c7   : > { %v1265_v46 = vpop.f32.mrb[92].mxu0  ;;  %v1478_v61 = vmax.f32 %v1422_v54, 0.0  ;;  %v4703_v54 = vld [vmem:[#allocation8 + $0x214] ss:$8 sps:$4 sm:$0xff]  }
 0x2c8   : > { %v1267_v48 = vpop.f32.mrb[93].mxu0 }
 0x2c9   : > { %v1360_v50 = vmax.f32 %v1265_v46, %v1267_v48  ;;  %v1269_v51 = vpop.f32.mrb[94].mxu0 }
 0x2ca   : > { %v1271_v52 = vpop.f32.mrb[95].mxu0 }
 0x2cb   : > { %v1423_v55 = vadd.f32 %v5663_v57, %v1360_v50  ;;  %v1361_v56 = vmax.f32 %v1269_v51, %v1271_v52 }
 0x2cd   : > { %v1479_v59 = vmax.f32 %v1423_v55, 0.0  ;;  %v1424_v60 = vadd.f32 %v5663_v57, %v1361_v56 }
 0x2cf   : > { %v1511_v62 = vmax.f32 %v1477_v58, %v1479_v59  ;;  %v1480_v63 = vmax.f32 %v1424_v60, 0.0  ;;  %v1275_v1 = vpop.f32.mrb[96].mxu0  ;;  %v4701_v59 = vld [vmem:[#allocation8 + $0x210] ss:$8 sps:$4 sm:$0xff]  }
 0x2d0   : > { %v1277_v2 = vpop.f32.mrb[97].mxu0 }
 0x2d1   : > { %v1512_v3 = vmax.f32 %v1478_v61, %v1480_v63  ;;  %v1362_v4 = vmax.f32 %v1275_v1, %v1277_v2  ;;  %v1279_v5 = vpop.f32.mrb[98].mxu0  ;;  %v4704_v1 = vld [vmem:[#allocation8 + $0x220] ss:$8 sps:$4 sm:$0xff]  }
 0x2d2   : > { %v1281_v6 = vpop.f32.mrb[99].mxu0 }
 0x2d3   : > { %v5757_v8 = vpack.c.bf16 %v1512_v3, %v1511_v62  ;;  %v1363_v9 = vmax.f32 %v1279_v5, %v1281_v6  ;;  %v1425_v13 = vadd.f32 %v5663_v57, %v1362_v4  ;;  %v4706_v62 = vld [vmem:[#allocation8 + $0x224] ss:$8 sps:$4 sm:$0xff]   ;;  %v4709_v3 = vld [vmem:[#allocation8 + $0x234] ss:$8 sps:$4 sm:$0xff]   ;;  %v4710_v6 = vld [vmem:[#allocation8 + $0x240] ss:$8 sps:$4 sm:$0xff]  }
 0x2d4   : > { %v4724_v4 = vld [vmem:[#allocation11 + $0x4] ss:$8 sps:$4 sm:$0xff]  }
 0x2d5   : > { %2163 = vmatprep.mubr.bf16.mxu1 %v5757_v8  ;;  %v1426_v19 = vadd.f32 %v5663_v57, %v1363_v9  ;;  %v1481_v23 = vmax.f32 %v1425_v13, 0.0  ;;  %v4712_v5 = vld [vmem:[#allocation8 + $0x244] ss:$8 sps:$4 sm:$0xff]   ;;  %3326 = vmatprep.subr.bf16.mxu0 %v4724_v4  ;;  %v4715_v9 = vld [vmem:[#allocation8 + $0x254] ss:$8 sps:$4 sm:$0xff]  }
 0x2d6   : > { %2164 = vmatmul.mubr.bf16.gmra.mrb[48].mxu1 %v5749_v44  ;;  %v4718_v13 = vld [vmem:[#allocation8 + $0x264] ss:$8 sps:$4 sm:$0xff]  }
 0x2d7   : > { %v1285_v10 = vpop.f32.mrb[100].mxu0  ;;  %v1482_v26 = vmax.f32 %v1426_v19, 0.0  ;;  %v4728_v19 = vld [vmem:[#allocation11 + $0x20] ss:$8 sps:$4 sm:$0xff]  }
 0x2d8   : > { %v1287_v12 = vpop.f32.mrb[101].mxu0 }
 0x2d9   : > { %v1364_v14 = vmax.f32 %v1285_v10, %v1287_v12  ;;  %v1289_v15 = vpop.f32.mrb[102].mxu0  ;;  %v4725_v10 = vld [vmem:[#allocation11 + $0x10] ss:$8 sps:$4 sm:$0xff]   ;;  %v4727_v12 = vld [vmem:[#allocation11 + $0x14] ss:$8 sps:$4 sm:$0xff]  }
 0x2da   : > { %v1291_v18 = vpop.f32.mrb[103].mxu0 }
 0x2db   : > { %v1427_v20 = vadd.f32 %v5663_v57, %v1364_v14  ;;  %v1365_v22 = vmax.f32 %v1289_v15, %v1291_v18  ;;  %v4716_v14 = vld [vmem:[#allocation8 + $0x260] ss:$8 sps:$4 sm:$0xff]   ;;  %v4721_v15 = vld [vmem:[#allocation8 + $0x274] ss:$8 sps:$4 sm:$0xff]   ;;  %v4719_v18 = vld [vmem:[#allocation8 + $0x270] ss:$8 sps:$4 sm:$0xff]  }
 0x2dd   : > { %v1483_v24 = vmax.f32 %v1427_v20, 0.0  ;;  %v1428_v25 = vadd.f32 %v5663_v57, %v1365_v22  ;;  %v4730_v20 = vld [vmem:[#allocation11 + $0x24] ss:$8 sps:$4 sm:$0xff]   ;;  %v4731_v22 = vld [vmem:[#allocation11 + $0x30] ss:$8 sps:$4 sm:$0xff]  }
 0x2df   : > { %v1513_v28 = vmax.f32 %v1481_v23, %v1483_v24  ;;  %v1484_v29 = vmax.f32 %v1428_v25, 0.0  ;;  %v1295_v30 = vpop.f32.mrb[104].mxu0  ;;  %v4733_v23 = vld [vmem:[#allocation11 + $0x34] ss:$8 sps:$4 sm:$0xff]   ;;  %v4734_v24 = vld [vmem:[#allocation11 + $0x40] ss:$8 sps:$4 sm:$0xff]  }
 0x2e0   : > { %v1297_v31 = vpop.f32.mrb[105].mxu0  ;;  %v4736_v25 = vld [vmem:[#allocation11 + $0x44] ss:$8 sps:$4 sm:$0xff]  }
 0x2e1   : > { %v1514_v32 = vmax.f32 %v1482_v26, %v1484_v29  ;;  %v1366_v33 = vmax.f32 %v1295_v30, %v1297_v31  ;;  %v1299_v34 = vpop.f32.mrb[106].mxu0  ;;  %v4737_v26 = vld [vmem:[#allocation11 + $0x50] ss:$8 sps:$4 sm:$0xff]   ;;  %v4740_v29 = vld [vmem:[#allocation11 + $0x60] ss:$8 sps:$4 sm:$0xff]  }
 0x2e2   : > { %v1301_v35 = vpop.f32.mrb[107].mxu0  ;;  %v4742_v30 = vld [vmem:[#allocation11 + $0x64] ss:$8 sps:$4 sm:$0xff]   ;;  %v4745_v31 = vld [vmem:[#allocation11 + $0x74] ss:$8 sps:$4 sm:$0xff]  }
 0x2e3   : > { %v5765_v36 = vpack.c.bf16 %v1514_v32, %v1513_v28  ;;  %v1367_v37 = vmax.f32 %v1299_v34, %v1301_v35  ;;  %v1429_v39 = vadd.f32 %v5663_v57, %v1366_v33  ;;  %v4739_v28 = vld [vmem:[#allocation11 + $0x54] ss:$8 sps:$4 sm:$0xff]   ;;  %v4743_v32 = vld [vmem:[#allocation11 + $0x70] ss:$8 sps:$4 sm:$0xff]   ;;  %v4748_v33 = vld [vmem:[#allocation11 + $0x84] ss:$8 sps:$4 sm:$0xff]  }
 0x2e4   : > { %v4746_v34 = vld [vmem:[#allocation11 + $0x80] ss:$8 sps:$4 sm:$0xff]   ;;  %v4751_v35 = vld [vmem:[#allocation11 + $0x94] ss:$8 sps:$4 sm:$0xff]  }
 0x2e5   : > { %2173 = vmatprep.mubr.bf16.mxu1 %v5765_v36  ;;  %v1430_v43 = vadd.f32 %v5663_v57, %v1367_v37  ;;  %v1485_v50 = vmax.f32 %v1429_v39, 0.0  ;;  %v4749_v37 = vld [vmem:[#allocation11 + $0x90] ss:$8 sps:$4 sm:$0xff]   ;;  %v4754_v39 = vld [vmem:[#allocation11 + $0xa4] ss:$8 sps:$4 sm:$0xff]  }
 0x2e6   : > { %2174 = vmatmul.mubr.bf16.gmra.mrb[52].mxu1 %v5757_v8 }
 0x2e7   : > { %2216 = vmatprep.mubr.bf16.mxu1 %v5677_v47  ;;  %v1305_v41 = vpop.f32.mrb[108].mxu0  ;;  %v1486_v55 = vmax.f32 %v1430_v43, 0.0  ;;  %v4755_v43 = vld [vmem:[#allocation11 + $0xb0] ss:$8 sps:$4 sm:$0xff]  }
 0x2e8   : > { %v1307_v42 = vpop.f32.mrb[109].mxu0 }
 0x2e9   : > { %v1368_v45 = vmax.f32 %v1305_v41, %v1307_v42  ;;  %v1309_v46 = vpop.f32.mrb[110].mxu0  ;;  %v4752_v41 = vld [vmem:[#allocation11 + $0xa0] ss:$8 sps:$4 sm:$0xff]   ;;  %v4757_v42 = vld [vmem:[#allocation11 + $0xb4] ss:$8 sps:$4 sm:$0xff]  }
 0x2ea   : > { %v1311_v48 = vpop.f32.mrb[111].mxu0 }
 0x2eb   : > { %v1431_v51 = vadd.f32 %v5663_v57, %v1368_v45  ;;  %v1369_v52 = vmax.f32 %v1309_v46, %v1311_v48  ;;  %v4760_v45 = vld [vmem:[#allocation11 + $0xc4] ss:$8 sps:$4 sm:$0xff]   ;;  %v4758_v46 = vld [vmem:[#allocation11 + $0xc0] ss:$8 sps:$4 sm:$0xff]   ;;  %v4763_v48 = vld [vmem:[#allocation11 + $0xd4] ss:$8 sps:$4 sm:$0xff]  }
 0x2ed   : > { %v1487_v56 = vmax.f32 %v1431_v51, 0.0  ;;  %v1432_v58 = vadd.f32 %v5663_v57, %v1369_v52  ;;  %v4722_v57 = vld [vmem:[#allocation11] ss:$8 sps:$4 sm:$0xff]  }
 0x2ee   : > { %2217 = vmatmul.mubr.bf16.vlgmr.msra.gmra.mrb[0].mxu1 %v5669_v21  ;;  %v4707_v21 = vld [vmem:[#allocation8 + $0x230] ss:$8 sps:$4 sm:$0xff]   ;;  %3327 = vmatpush1.bf16.msra.mxu0 %v4722_v57 }
 0x2ef   : > { %2358 = vmatpush1.bf16.msra.mxu1 %v4698_v49  ;;  %2226 = vmatprep.mubr.bf16.mxu1 %v5685_v11  ;;  %v1515_v60 = vmax.f32 %v1485_v50, %v1487_v56  ;;  %v1488_v61 = vmax.f32 %v1432_v58, 0.0  ;;  %v4761_v49 = vld [vmem:[#allocation11 + $0xd0] ss:$8 sps:$4 sm:$0xff]   ;;  %v5831_v50 = vld [vmem:[#allocation10] ss:$0 sm:$0xff] }
 0x2f0   : > { %2359 = vmatprep.subr.bf16.mxu1 %v4703_v54  ;;  %3328 = vmatprep.subr.bf16.mxu0 %v4727_v12 }
 0x2f1   : > { %v1516_v63 = vmax.f32 %v1486_v55, %v1488_v61 }
 0x2f2   : > { %3329 = vmatpush1.bf16.msra.mxu0 %v4725_v10 }
 0x2f3   : > { %2360 = vmatpush1.bf16.msra.mxu1 %v4701_v59  ;;  %v5776_v2 = vpack.c.bf16 %v1516_v63, %v1515_v60  ;;  %3330 = vmatprep.subr.bf16.mxu0 %v4730_v20 }
 0x2f4   : > { %2361 = vmatprep.subr.bf16.mxu1 %v4706_v62 }
 0x2f6   : > { %2227 = vmatmul.mubr.bf16.gmra.mrb[4].mxu1 %v5677_v47  ;;  %v4713_v47 = vld [vmem:[#allocation8 + $0x250] ss:$8 sps:$4 sm:$0xff]   ;;  %3331 = vmatpush1.bf16.msra.mxu0 %v4728_v19 }
 0x2f7   : > { %2236 = vmatprep.mubr.bf16.mxu1 %v5693_v40  ;;  %2362 = vmatpush1.bf16.msra.mxu1 %v4704_v1 }
 0x2f8   : > { %2363 = vmatprep.subr.bf16.mxu1 %v4709_v3  ;;  %3332 = vmatprep.subr.bf16.mxu0 %v4733_v23 }
 0x2fa   : > { %3333 = vmatpush1.bf16.msra.mxu0 %v4731_v22 }
 0x2fb   : > { %2364 = vmatpush1.bf16.msra.mxu1 %v4707_v21  ;;  %3334 = vmatprep.subr.bf16.mxu0 %v4736_v25 }
 0x2fc   : > { %2365 = vmatprep.subr.bf16.mxu1 %v4712_v5 }
 0x2fe   : > { %2237 = vmatmul.mubr.bf16.gmra.mrb[8].mxu1 %v5685_v11  ;;  %3335 = vmatpush1.bf16.msra.mxu0 %v4734_v24 }
 0x2ff   : > { %2246 = vmatprep.mubr.bf16.mxu1 %v5701_v7  ;;  %2366 = vmatpush1.bf16.msra.mxu1 %v4710_v6 }
 0x300   : > { %2367 = vmatprep.subr.bf16.mxu1 %v4715_v9  ;;  %3336 = vmatprep.subr.bf16.mxu0 %v4739_v28 }
 0x302   : > { %3337 = vmatpush1.bf16.msra.mxu0 %v4737_v26 }
 0x303   : > { %2368 = vmatpush1.bf16.msra.mxu1 %v4713_v47  ;;  %3338 = vmatprep.subr.bf16.mxu0 %v4742_v30 }
 0x304   : > { %2369 = vmatprep.subr.bf16.mxu1 %v4718_v13 }
 0x306   : > { %2247 = vmatmul.mubr.bf16.gmra.mrb[12].mxu1 %v5693_v40  ;;  %3339 = vmatpush1.bf16.msra.mxu0 %v4740_v29 }
 0x307   : > { %2256 = vmatprep.mubr.bf16.mxu1 %v5709_v38  ;;  %2370 = vmatpush1.bf16.msra.mxu1 %v4716_v14 }
 0x308   : > { %2371 = vmatprep.subr.bf16.mxu1 %v4721_v15  ;;  %3340 = vmatprep.subr.bf16.mxu0 %v4745_v31 }
 0x30a   : > { %3341 = vmatpush1.bf16.msra.mxu0 %v4743_v32 }
 0x30b   : > { %2372 = vmatpush1.bf16.msra.mxu1 %v4719_v18  ;;  %3342 = vmatprep.subr.bf16.mxu0 %v4748_v33 }
 0x30e   : > { %2257 = vmatmul.mubr.bf16.gmra.mrb[16].mxu1 %v5701_v7  ;;  %3343 = vmatpush1.bf16.msra.mxu0 %v4746_v34 }
 0x30f   : > { %2266 = vmatprep.mubr.bf16.mxu1 %v5717_v0  ;;  %3344 = vmatprep.subr.bf16.mxu0 %v4751_v35 }
 0x312   : > { %3345 = vmatpush1.bf16.msra.mxu0 %v4749_v37 }
 0x313   : > { %3346 = vmatprep.subr.bf16.mxu0 %v4754_v39 }
 0x316   : > { %2267 = vmatmul.mubr.bf16.gmra.mrb[20].mxu1 %v5709_v38  ;;  %3347 = vmatpush1.bf16.msra.mxu0 %v4752_v41 }
 0x317   : > { %2276 = vmatprep.mubr.bf16.mxu1 %v5725_v27  ;;  %3348 = vmatprep.subr.bf16.mxu0 %v4757_v42 }
 0x31a   : > { %3349 = vmatpush1.bf16.msra.mxu0 %v4755_v43  ;;  %v4770_v43 = vld [vmem:[#allocation11 + $0x100] ss:$8 sps:$4 sm:$0xff]  }
 0x31b   : > { %3350 = vmatprep.subr.bf16.mxu0 %v4760_v45  ;;  %v4775_v45 = vld [vmem:[#allocation11 + $0x114] ss:$8 sps:$4 sm:$0xff]  }
 0x31e   : > { %2277 = vmatmul.mubr.bf16.gmra.mrb[24].mxu1 %v5717_v0  ;;  %3351 = vmatpush1.bf16.msra.mxu0 %v4758_v46 }
 0x31f   : > { %2286 = vmatprep.mubr.bf16.mxu1 %v5733_v53  ;;  %3352 = vmatprep.subr.bf16.mxu0 %v4763_v48  ;;  %v4773_v48 = vld [vmem:[#allocation11 + $0x110] ss:$8 sps:$4 sm:$0xff]  }
 0x322   : > { %3353 = vmatpush1.bf16.msra.mxu0 %v4761_v49 }
 0x326   : > { %2287 = vmatmul.mubr.bf16.gmra.mrb[28].mxu1 %v5725_v27 }
 0x327   : > { %2296 = vmatprep.mubr.bf16.mxu1 %v5741_v16 }
 0x32e   : > { %2297 = vmatmul.mubr.bf16.gmra.mrb[32].mxu1 %v5733_v53 }
 0x32f   : > { %2306 = vmatprep.mubr.bf16.mxu1 %v5749_v44 }
 0x336   : > { %2307 = vmatmul.mubr.bf16.gmra.mrb[36].mxu1 %v5741_v16 }
 0x337   : > { %2316 = vmatprep.mubr.bf16.mxu1 %v5757_v8 }
 0x33e   : > { %2317 = vmatmul.mubr.bf16.gmra.mrb[40].mxu1 %v5749_v44 }
 0x33f   : > { %2326 = vmatprep.mubr.bf16.mxu1 %v5765_v36 }
 0x346   : > { %2327 = vmatmul.mubr.bf16.gmra.mrb[44].mxu1 %v5757_v8 }
 0x347   : > { %2336 = vmatprep.mubr.bf16.mxu1 %v5776_v2 }
 0x34e   : > { %2337 = vmatmul.mubr.bf16.gmra.mrb[48].mxu1 %v5765_v36 }
 0x34f   : > { %2346 = vmatprep.mubr.bf16.mxu1 %v5232_v17 }
 0x356   : > { %2347 = vmatmul.mubr.bf16.gmra.mrb[52].mxu1 %v5776_v2 }
 0x357   : > { %2389 = vmatprep.mubr.bf16.mxu1 %v5232_v17 }
 0x35e   : > { %2390 = vmatmul.mubr.bf16.vlgmr.msra.gmra.mrb[0].mxu1 %v5685_v11  ;;  %v4764_v11 = vld [vmem:[#allocation11 + $0xe0] ss:$8 sps:$4 sm:$0xff]  }
 0x35f   : > { %2399 = vmatprep.mubr.bf16.mxu1 %v5232_v17 }
 0x366   : > { %2400 = vmatmul.mubr.bf16.gmra.mrb[4].mxu1 %v5693_v40  ;;  %v4766_v40 = vld [vmem:[#allocation11 + $0xe4] ss:$8 sps:$4 sm:$0xff]  }
 0x367   : > { %2409 = vmatprep.mubr.bf16.mxu1 %v5232_v17  ;;  %3354 = vmatprep.subr.bf16.mxu0 %v4766_v40 }
 0x368   : > { %3355 = vmatpush1.bf16.msra.mxu0 %v4764_v11  ;;  %v4778_v11 = vld [vmem:[#allocation11 + $0x124] ss:$8 sps:$4 sm:$0xff]  }
 0x36e   : > { %2410 = vmatmul.mubr.bf16.gmra.mrb[8].mxu1 %v5701_v7  ;;  %v4767_v7 = vld [vmem:[#allocation11 + $0xf0] ss:$8 sps:$4 sm:$0xff]  }
 0x36f   : > { %2419 = vmatprep.mubr.bf16.mxu1 %v5232_v17 }
 0x376   : > { %2420 = vmatmul.mubr.bf16.gmra.mrb[12].mxu1 %v5709_v38  ;;  %v4769_v38 = vld [vmem:[#allocation11 + $0xf4] ss:$8 sps:$4 sm:$0xff]  }
 0x377   : > { %2429 = vmatprep.mubr.bf16.mxu1 %v5232_v17  ;;  %3356 = vmatprep.subr.bf16.mxu0 %v4769_v38 }
 0x378   : > { %3357 = vmatpush1.bf16.msra.mxu0 %v4767_v7 }
 0x37e   : > { %2430 = vmatmul.mubr.bf16.gmra.mrb[16].mxu1 %v5717_v0  ;;  %v4772_v0 = vld [vmem:[#allocation11 + $0x104] ss:$8 sps:$4 sm:$0xff]  }
 0x37f   : > { %2439 = vmatprep.mubr.bf16.mxu1 %v5232_v17  ;;  %3369 = vmatprep.subr.bf16.mxu0 %v4772_v0 }
 0x386   : > { %2440 = vmatmul.mubr.bf16.gmra.mrb[20].mxu1 %v5725_v27 }
 0x387   : > { %2449 = vmatprep.mubr.bf16.mxu1 %v5232_v17 }
 0x38e   : > { %2450 = vmatmul.mubr.bf16.gmra.mrb[24].mxu1 %v5733_v53 }
 0x38f   : > { %2459 = vmatprep.mubr.bf16.mxu1 %v5232_v17 }
 0x396   : > { %2460 = vmatmul.mubr.bf16.gmra.mrb[28].mxu1 %v5741_v16 }
 0x397   : > { %2469 = vmatprep.mubr.bf16.mxu1 %v5232_v17 }
 0x39e   : > { %2470 = vmatmul.mubr.bf16.gmra.mrb[32].mxu1 %v5749_v44 }
 0x39f   : > { %2479 = vmatprep.mubr.bf16.mxu1 %v5232_v17 }
 0x3a6   : > { %2480 = vmatmul.mubr.bf16.gmra.mrb[36].mxu1 %v5757_v8 }
 0x3a7   : > { %2489 = vmatprep.mubr.bf16.mxu1 %v5232_v17 }
 0x3ae   : > { %2490 = vmatmul.mubr.bf16.gmra.mrb[40].mxu1 %v5765_v36 }
 0x3af   : > { %2499 = vmatprep.mubr.bf16.mxu1 %v5232_v17 }
 0x3b6   : > { %2500 = vmatmul.mubr.bf16.gmra.mrb[44].mxu1 %v5776_v2 }
 0x3b7   : > { %2509 = vmatprep.mubr.bf16.mxu1 %v5232_v17 }
 0x3be   : > { %2510 = vmatmul.mubr.bf16.gmra.mrb[48].mxu1 %v5232_v17 }
 0x3bf   : > { %2519 = vmatprep.mubr.bf16.mxu1 %v5232_v17 }
 0x3c6   : > { %2520 = vmatmul.mubr.bf16.gmra.mrb[52].mxu1 %v5232_v17 }
 0x431   : > { %v2391_v27 = vpop.f32.mrb[0].mxu1 }
 0x432   : > { %v2393_v53 = vpop.f32.mrb[1].mxu1 }
 0x433   : > { %v2530_v16 = vmax.f32 %v2391_v27, %v2393_v53  ;;  %v2395_v44 = vpop.f32.mrb[2].mxu1 }
 0x434   : > { %v2397_v8 = vpop.f32.mrb[3].mxu1 }
 0x435   : > { %v2531_v36 = vmax.f32 %v2395_v44, %v2397_v8  ;;  %v2565_v54 = vadd.f32 %v5831_v50, %v2530_v16  ;;  %v4776_v44 = vld [vmem:[#allocation11 + $0x120] ss:$8 sps:$4 sm:$0xff]   ;;  %v4781_v8 = vld [vmem:[#allocation11 + $0x134] ss:$8 sps:$4 sm:$0xff]  }
 0x437   : > { %v2566_v59 = vadd.f32 %v5831_v50, %v2531_v36  ;;  %v2593_v62 = vmax.f32 %v2565_v54, 0.0 }
 0x439   : > { %v2401_v51 = vpop.f32.mrb[4].mxu1  ;;  %v2594_v2 = vmax.f32 %v2566_v59, 0.0  ;;  %v4779_v59 = vld [vmem:[#allocation11 + $0x130] ss:$8 sps:$4 sm:$0xff]  }
 0x43a   : > { %v2403_v52 = vpop.f32.mrb[5].mxu1 }
 0x43b   : > { %v2532_v55 = vmax.f32 %v2401_v51, %v2403_v52  ;;  %v2405_v56 = vpop.f32.mrb[6].mxu1 }
 0x43c   : > { %v2407_v58 = vpop.f32.mrb[7].mxu1 }
 0x43d   : > { %v2567_v60 = vadd.f32 %v5831_v50, %v2532_v55  ;;  %v2533_v61 = vmax.f32 %v2405_v56, %v2407_v58 }
 0x43f   : > { %v2595_v63 = vmax.f32 %v2567_v60, 0.0  ;;  %v2568_v1 = vadd.f32 %v5831_v50, %v2533_v61  ;;  %v4784_v61 = vld [vmem:[#allocation11 + $0x144] ss:$8 sps:$4 sm:$0xff]  }
 0x441   : > { %v2621_v3 = vmax.f32 %v2593_v62, %v2595_v63  ;;  %v2596_v57 = vmax.f32 %v2568_v1, 0.0  ;;  %v2411_v4 = vpop.f32.mrb[8].mxu1 }
 0x442   : > { %v2413_v21 = vpop.f32.mrb[9].mxu1 }
 0x443   : > { %v2622_v5 = vmax.f32 %v2594_v2, %v2596_v57  ;;  %v2534_v6 = vmax.f32 %v2411_v4, %v2413_v21  ;;  %v2415_v9 = vpop.f32.mrb[10].mxu1  ;;  %v4782_v4 = vld [vmem:[#allocation11 + $0x140] ss:$8 sps:$4 sm:$0xff]   ;;  %v4787_v21 = vld [vmem:[#allocation11 + $0x154] ss:$8 sps:$4 sm:$0xff]  }
 0x444   : > { %v2417_v47 = vpop.f32.mrb[11].mxu1 }
 0x445   : > { %v2635_v10 = vpack.c.bf16 %v2622_v5, %v2621_v3  ;;  %v2535_v12 = vmax.f32 %v2415_v9, %v2417_v47  ;;  %v2569_v15 = vadd.f32 %v5831_v50, %v2534_v6  ;;  %v4785_v6 = vld [vmem:[#allocation11 + $0x150] ss:$8 sps:$4 sm:$0xff]   ;;  %v4790_v47 = vld [vmem:[#allocation11 + $0x164] ss:$8 sps:$4 sm:$0xff]  }
 0x447   : > { %v2570_v22 = vadd.f32 %v5831_v50, %v2535_v12  ;;  %v2597_v25 = vmax.f32 %v2569_v15, 0.0 }
 0x449   : > { %v2421_v13 = vpop.f32.mrb[12].mxu1  ;;  %v2598_v29 = vmax.f32 %v2570_v22, 0.0  ;;  %v4793_v22 = vld [vmem:[#allocation11 + $0x174] ss:$8 sps:$4 sm:$0xff]  }
 0x44a   : > { %v2423_v14 = vpop.f32.mrb[13].mxu1 }
 0x44b   : > { %v2536_v18 = vmax.f32 %v2421_v13, %v2423_v14  ;;  %v2425_v19 = vpop.f32.mrb[14].mxu1 }
 0x44c   : > { %v2427_v20 = vpop.f32.mrb[15].mxu1 }
 0x44d   : > { %v2571_v23 = vadd.f32 %v5831_v50, %v2536_v18  ;;  %v2537_v24 = vmax.f32 %v2425_v19, %v2427_v20  ;;  %v4788_v20 = vld [vmem:[#allocation11 + $0x160] ss:$8 sps:$4 sm:$0xff]  }
 0x44f   : > { %v2599_v26 = vmax.f32 %v2571_v23, 0.0  ;;  %v2572_v28 = vadd.f32 %v5831_v50, %v2537_v24 }
 0x451   : > { %v2623_v30 = vmax.f32 %v2597_v25, %v2599_v26  ;;  %v2600_v31 = vmax.f32 %v2572_v28, 0.0  ;;  %v2431_v32 = vpop.f32.mrb[16].mxu1 }
 0x452   : > { %v2433_v33 = vpop.f32.mrb[17].mxu1 }
 0x453   : > { %v2624_v34 = vmax.f32 %v2598_v29, %v2600_v31  ;;  %v2538_v35 = vmax.f32 %v2431_v32, %v2433_v33  ;;  %v2435_v37 = vpop.f32.mrb[18].mxu1  ;;  %v4791_v31 = vld [vmem:[#allocation11 + $0x170] ss:$8 sps:$4 sm:$0xff]   ;;  %v4796_v33 = vld [vmem:[#allocation11 + $0x184] ss:$8 sps:$4 sm:$0xff]  }
 0x454   : > { %v2437_v39 = vpop.f32.mrb[19].mxu1 }
 0x455   : > { %v2539_v41 = vmax.f32 %v2435_v37, %v2437_v39  ;;  %v2636_v42 = vpack.c.bf16 %v2624_v34, %v2623_v30  ;;  %v2573_v40 = vadd.f32 %v5831_v50, %v2538_v35 }
 0x457   : > { %3358 = vmatprep.mubr.bf16.mxu0 %v2636_v42  ;;  %v2574_v27 = vadd.f32 %v5831_v50, %v2539_v41  ;;  %v2601_v36 = vmax.f32 %v2573_v40, 0.0  ;;  %v4794_v42 = vld [vmem:[#allocation11 + $0x180] ss:$8 sps:$4 sm:$0xff]   ;;  %v4797_v40 = vld [vmem:[#allocation11 + $0x190] ss:$8 sps:$4 sm:$0xff]  }
 0x458   : > { %3359 = vmatmul.mubr.bf16.vlgmr.msra.gmra.mrb[112].mxu0 %v2635_v10 }
 0x459   : > { %3370 = vmatpush1.bf16.msra.mxu0 %v4770_v43  ;;  %v2441_v46 = vpop.f32.mrb[20].mxu1  ;;  %v2602_v54 = vmax.f32 %v2574_v27, 0.0 }
 0x45a   : > { %v2443_v49 = vpop.f32.mrb[21].mxu1  ;;  %3371 = vmatprep.subr.bf16.mxu0 %v4775_v45  ;;  %v4799_v45 = vld [vmem:[#allocation11 + $0x194] ss:$8 sps:$4 sm:$0xff]  }
 0x45b   : > { %v2540_v7 = vmax.f32 %v2441_v46, %v2443_v49  ;;  %v2445_v38 = vpop.f32.mrb[22].mxu1  ;;  %v4890_v46 = vld [vmem:[#allocation14 + $0x40] sm:$0xff]   ;;  %v4892_v49 = vld [vmem:[#allocation14 + $0x48] sm:$0xff]  }
 0x45c   : > { %v2447_v0 = vpop.f32.mrb[23].mxu1  ;;  %4194 = vmatprep.subr.bf16.mxu1 %v4890_v46 }
 0x45d   : > { %v2575_v53 = vadd.f32 %v5831_v50, %v2540_v7  ;;  %v2541_v16 = vmax.f32 %v2445_v38, %v2447_v0  ;;  %3372 = vmatpush1.bf16.msra.mxu0 %v4773_v48  ;;  %v4891_v48 = vld [vmem:[#allocation14] sm:$0xff]  }
 0x45e   : > { %3373 = vmatprep.subr.bf16.mxu0 %v4778_v11  ;;  %v4802_v38 = vld [vmem:[#allocation11 + $0x1a4] ss:$8 sps:$4 sm:$0xff]   ;;  %4195 = vmatpush3.bf16.msra.mxu1 %v4891_v48  ;;  %v4903_v48 = vld [vmem:[#allocation14 + $0x30] sm:$0xff]  }
 0x45f   : > { %v2603_v51 = vmax.f32 %v2575_v53, 0.0  ;;  %v2576_v52 = vadd.f32 %v5831_v50, %v2541_v16  ;;  %v4893_v16 = vld [vmem:[#allocation14 + $0x8] sm:$0xff]   ;;  %4196 = vmatprep.subr.bf16.mxu1 %v4892_v49  ;;  %v4904_v49 = vld [vmem:[#allocation14 + $0x78] sm:$0xff]  }
 0x461   : > { %v5845_v55 = vmax.f32 %v2601_v36, %v2603_v51  ;;  %v2604_v56 = vmax.f32 %v2576_v52, 0.0  ;;  %3374 = vmatpush1.bf16.msra.mxu0 %v4776_v44  ;;  %v2451_v58 = vpop.f32.mrb[24].mxu1 }
 0x462   : > { %v2453_v60 = vpop.f32.mrb[25].mxu1  ;;  %3375 = vmatprep.subr.bf16.mxu0 %v4781_v8  ;;  %v4894_v8 = vld [vmem:[#allocation14 + $0x50] sm:$0xff]   ;;  %4197 = vmatpush3.bf16.msra.mxu1 %v4893_v16 }
 0x463   : > { %v5847_v62 = vmax.f32 %v2602_v54, %v2604_v56  ;;  %v2542_v63 = vmax.f32 %v2451_v58, %v2453_v60  ;;  %v2455_v1 = vpop.f32.mrb[26].mxu1  ;;  %v4800_v54 = vld [vmem:[#allocation11 + $0x1a0] ss:$8 sps:$4 sm:$0xff]   ;;  %v4805_v56 = vld [vmem:[#allocation11 + $0x1b4] ss:$8 sps:$4 sm:$0xff]   ;;  %4198 = vmatprep.subr.bf16.mxu1 %v4894_v8 }
 0x464   : > { %v2457_v2 = vpop.f32.mrb[27].mxu1 }
 0x465   : > { %v2637_v3 = vpack.c.bf16 %v5847_v62, %v5845_v55  ;;  %v2543_v57 = vmax.f32 %v2455_v1, %v2457_v2  ;;  %3376 = vmatpush1.bf16.msra.mxu0 %v4779_v59  ;;  %v2577_v10 = vadd.f32 %v5831_v50, %v2542_v63  ;;  %v4896_v63 = vld [vmem:[#allocation14 + $0x58] sm:$0xff]  }
 0x466   : > { %3377 = vmatprep.subr.bf16.mxu0 %v4784_v61  ;;  %v4895_v61 = vld [vmem:[#allocation14 + $0x10] sm:$0xff]   ;;  %v4824_v55 = vld [vmem:[#allocation11 + $0x220] ss:$8 sps:$4 sm:$0xff]  }
 0x467   : > { %v2578_v15 = vadd.f32 %v5831_v50, %v2543_v57  ;;  %v2605_v23 = vmax.f32 %v2577_v10, 0.0  ;;  %4199 = vmatpush3.bf16.msra.mxu1 %v4895_v61  ;;  %v4829_v62 = vld [vmem:[#allocation11 + $0x234] ss:$8 sps:$4 sm:$0xff]  }
 0x468   : > { %4200 = vmatprep.subr.bf16.mxu1 %v4896_v63  ;;  %v4826_v63 = vld [vmem:[#allocation11 + $0x224] ss:$8 sps:$4 sm:$0xff]  }
 0x469   : > { %3378 = vmatpush1.bf16.msra.mxu0 %v4782_v4  ;;  %v2461_v5 = vpop.f32.mrb[28].mxu1  ;;  %v2606_v26 = vmax.f32 %v2578_v15, 0.0 }
 0x46a   : > { %v2463_v9 = vpop.f32.mrb[29].mxu1  ;;  %3379 = vmatprep.subr.bf16.mxu0 %v4787_v21  ;;  %v4803_v21 = vld [vmem:[#allocation11 + $0x1b0] ss:$8 sps:$4 sm:$0xff]  }
 0x46b   : > { %v2544_v12 = vmax.f32 %v2461_v5, %v2463_v9  ;;  %v2465_v13 = vpop.f32.mrb[30].mxu1 }
 0x46c   : > { %v2467_v14 = vpop.f32.mrb[31].mxu1 }
 0x46d   : > { %v2579_v18 = vadd.f32 %v5831_v50, %v2544_v12  ;;  %v2545_v19 = vmax.f32 %v2465_v13, %v2467_v14  ;;  %3380 = vmatpush1.bf16.msra.mxu0 %v4785_v6  ;;  %v4808_v6 = vld [vmem:[#allocation11 + $0x1c4] ss:$8 sps:$4 sm:$0xff]   ;;  %v4897_v12 = vld [vmem:[#allocation14 + $0x18] sm:$0xff]  }
 0x46e   : > { %3381 = vmatprep.subr.bf16.mxu0 %v4790_v47  ;;  %v4898_v14 = vld [vmem:[#allocation14 + $0x60] sm:$0xff]   ;;  %4201 = vmatpush3.bf16.msra.mxu1 %v4897_v12 }
 0x46f   : > { %v2607_v24 = vmax.f32 %v2579_v18, 0.0  ;;  %v2580_v25 = vadd.f32 %v5831_v50, %v2545_v19  ;;  %v4806_v19 = vld [vmem:[#allocation11 + $0x1c0] ss:$8 sps:$4 sm:$0xff]   ;;  %4202 = vmatprep.subr.bf16.mxu1 %v4898_v14 }
 0x471   : > { %v2627_v28 = vmax.f32 %v2605_v23, %v2607_v24  ;;  %v2608_v29 = vmax.f32 %v2580_v25, 0.0  ;;  %3382 = vmatpush1.bf16.msra.mxu0 %v4788_v20  ;;  %v2471_v30 = vpop.f32.mrb[32].mxu1  ;;  %v4811_v20 = vld [vmem:[#allocation11 + $0x1d4] ss:$8 sps:$4 sm:$0xff]   ;;  %v4900_v23 = vld [vmem:[#allocation14 + $0x68] sm:$0xff]  }
 0x472   : > { %v2473_v32 = vpop.f32.mrb[33].mxu1  ;;  %3383 = vmatprep.subr.bf16.mxu0 %v4793_v22  ;;  %v4899_v22 = vld [vmem:[#allocation14 + $0x20] sm:$0xff]   ;;  %v4809_v25 = vld [vmem:[#allocation11 + $0x1d0] ss:$8 sps:$4 sm:$0xff]  }
 0x473   : > { %v2628_v34 = vmax.f32 %v2606_v26, %v2608_v29  ;;  %v2546_v35 = vmax.f32 %v2471_v30, %v2473_v32  ;;  %v2475_v37 = vpop.f32.mrb[34].mxu1  ;;  %4203 = vmatpush3.bf16.msra.mxu1 %v4899_v22  ;;  %v4901_v32 = vld [vmem:[#allocation14 + $0x28] sm:$0xff]  }
 0x474   : > { %v2477_v39 = vpop.f32.mrb[35].mxu1  ;;  %4204 = vmatprep.subr.bf16.mxu1 %v4900_v23 }
 0x475   : > { %v2547_v41 = vmax.f32 %v2475_v37, %v2477_v39  ;;  %3384 = vmatpush1.bf16.msra.mxu0 %v4791_v31  ;;  %v2638_v43 = vpack.c.bf16 %v2628_v34, %v2627_v28  ;;  %v2581_v0 = vadd.f32 %v5831_v50, %v2546_v35  ;;  %v4814_v28 = vld [vmem:[#allocation11 + $0x1e4] ss:$8 sps:$4 sm:$0xff]   ;;  %v4902_v34 = vld [vmem:[#allocation14 + $0x70] sm:$0xff]  }
 0x476   : > { %3385 = vmatprep.subr.bf16.mxu0 %v4796_v33 }
 0x477   : > { %3401 = vmatprep.mubr.bf16.mxu0 %v2638_v43  ;;  %v2582_v36 = vadd.f32 %v5831_v50, %v2547_v41  ;;  %v2609_v58 = vmax.f32 %v2581_v0, 0.0  ;;  %v4812_v41 = vld [vmem:[#allocation11 + $0x1e0] ss:$8 sps:$4 sm:$0xff]   ;;  %4205 = vmatpush3.bf16.msra.mxu1 %v4901_v32  ;;  %v4815_v0 = vld [vmem:[#allocation11 + $0x1f0] ss:$8 sps:$4 sm:$0xff]  }
 0x478   : > { %4206 = vmatprep.subr.bf16.mxu1 %v4902_v34  ;;  %v4842_v32 = vld [vmem:[#allocation11 + $0x280] ss:$8 sps:$4 sm:$0xff]   ;;  %v4845_v34 = vld [vmem:[#allocation11 + $0x290] ss:$8 sps:$4 sm:$0xff]  }
 0x479   : > { %3386 = vmatpush1.bf16.msra.mxu0 %v4794_v42  ;;  %v2481_v11 = vpop.f32.mrb[36].mxu1  ;;  %v2610_v1 = vmax.f32 %v2582_v36, 0.0  ;;  %v4817_v42 = vld [vmem:[#allocation11 + $0x1f4] ss:$8 sps:$4 sm:$0xff]  }
 0x47a   : > { %v2483_v7 = vpop.f32.mrb[37].mxu1  ;;  %3387 = vmatprep.subr.bf16.mxu0 %v4799_v45  ;;  %v4905_v36 = vld [vmem:[#allocation14 + $0x38] sm:$0xff]  }
 0x47b   : > { %v2548_v27 = vmax.f32 %v2481_v11, %v2483_v7  ;;  %v2485_v53 = vpop.f32.mrb[38].mxu1  ;;  %4207 = vmatpush3.bf16.msra.mxu1 %v4903_v48  ;;  %v4862_v48 = vld [vmem:[#allocation11 + $0x2e4] ss:$8 sps:$4 sm:$0xff]  }
 0x47c   : > { %v2487_v44 = vpop.f32.mrb[39].mxu1  ;;  %4208 = vmatprep.subr.bf16.mxu1 %v4904_v49  ;;  %v4860_v49 = vld [vmem:[#allocation11 + $0x2e0] ss:$8 sps:$4 sm:$0xff]  }
 0x47d   : > { %v2583_v51 = vadd.f32 %v5831_v50, %v2548_v27  ;;  %v2549_v52 = vmax.f32 %v2485_v53, %v2487_v44  ;;  %3388 = vmatpush1.bf16.msra.mxu0 %v4797_v40  ;;  %v4820_v53 = vld [vmem:[#allocation11 + $0x204] ss:$8 sps:$4 sm:$0xff]  }
 0x47e   : > { %3389 = vmatprep.subr.bf16.mxu0 %v4802_v38 }
 0x47f   : > { %v2611_v59 = vmax.f32 %v2583_v51, 0.0  ;;  %v2584_v60 = vadd.f32 %v5831_v50, %v2549_v52  ;;  %4209 = vmatpush3.bf16.msra.mxu1 %v4905_v36  ;;  %v4880_v36 = vld [vmem:[#allocation11 + $0x344] ss:$8 sps:$4 sm:$0xff]  }
 0x481   : > { %v5859_v2 = vmax.f32 %v2609_v58, %v2611_v59  ;;  %v2612_v57 = vmax.f32 %v2584_v60, 0.0  ;;  %3390 = vmatpush1.bf16.msra.mxu0 %v4800_v54  ;;  %v2491_v4 = vpop.f32.mrb[40].mxu1  ;;  %v4818_v54 = vld [vmem:[#allocation11 + $0x200] ss:$8 sps:$4 sm:$0xff]   ;;  %v4823_v58 = vld [vmem:[#allocation11 + $0x214] ss:$8 sps:$4 sm:$0xff]  }
 0x482   : > { %v2493_v5 = vpop.f32.mrb[41].mxu1  ;;  %3391 = vmatprep.subr.bf16.mxu0 %v4805_v56  ;;  %v4821_v60 = vld [vmem:[#allocation11 + $0x210] ss:$8 sps:$4 sm:$0xff]  }
 0x483   : > { %v5861_v9 = vmax.f32 %v2610_v1, %v2612_v57  ;;  %v2550_v47 = vmax.f32 %v2491_v4, %v2493_v5  ;;  %v2495_v10 = vpop.f32.mrb[42].mxu1 }
 0x484   : > { %v2497_v13 = vpop.f32.mrb[43].mxu1 }
 0x485   : > { %v2639_v15 = vpack.c.bf16 %v5861_v9, %v5859_v2  ;;  %v2551_v18 = vmax.f32 %v2495_v10, %v2497_v13  ;;  %3392 = vmatpush1.bf16.msra.mxu0 %v4803_v21  ;;  %v2585_v29 = vadd.f32 %v5831_v50, %v2550_v47  ;;  %v4881_v2 = vld [vmem:[#allocation11 + $0x350] ss:$8 sps:$4 sm:$0xff]   ;;  %v4886_v9 = vld [vmem:[#allocation11 + $0x364] ss:$8 sps:$4 sm:$0xff]  }
 0x486   : > { %3393 = vmatprep.subr.bf16.mxu0 %v4808_v6 }
 0x487   : > { %v2586_v35 = vadd.f32 %v5831_v50, %v2551_v18  ;;  %v2613_v43 = vmax.f32 %v2585_v29, 0.0  ;;  %v4841_v29 = vld [vmem:[#allocation11 + $0x274] ss:$8 sps:$4 sm:$0xff]  }
 0x489   : > { %3394 = vmatpush1.bf16.msra.mxu0 %v4806_v19  ;;  %v2501_v24 = vpop.f32.mrb[44].mxu1  ;;  %v2614_v11 = vmax.f32 %v2586_v35, 0.0  ;;  %v4827_v19 = vld [vmem:[#allocation11 + $0x230] ss:$8 sps:$4 sm:$0xff]   ;;  %v4850_v35 = vld [vmem:[#allocation11 + $0x2a4] ss:$8 sps:$4 sm:$0xff]  }
 0x48a   : > { %v2503_v26 = vpop.f32.mrb[45].mxu1  ;;  %3395 = vmatprep.subr.bf16.mxu0 %v4811_v20  ;;  %v4832_v20 = vld [vmem:[#allocation11 + $0x244] ss:$8 sps:$4 sm:$0xff]  }
 0x48b   : > { %v2552_v30 = vmax.f32 %v2501_v24, %v2503_v26  ;;  %v2505_v31 = vpop.f32.mrb[46].mxu1  ;;  %v4830_v24 = vld [vmem:[#allocation11 + $0x240] ss:$8 sps:$4 sm:$0xff]   ;;  %v4833_v26 = vld [vmem:[#allocation11 + $0x250] ss:$8 sps:$4 sm:$0xff]  }
 0x48c   : > { %v2507_v33 = vpop.f32.mrb[47].mxu1 }
 0x48d   : > { %v2587_v37 = vadd.f32 %v5831_v50, %v2552_v30  ;;  %v2553_v39 = vmax.f32 %v2505_v31, %v2507_v33  ;;  %3396 = vmatpush1.bf16.msra.mxu0 %v4809_v25  ;;  %v4835_v25 = vld [vmem:[#allocation11 + $0x254] ss:$8 sps:$4 sm:$0xff]   ;;  %v4839_v30 = vld [vmem:[#allocation11 + $0x270] ss:$8 sps:$4 sm:$0xff]   ;;  %v4844_v31 = vld [vmem:[#allocation11 + $0x284] ss:$8 sps:$4 sm:$0xff]  }
 0x48e   : > { %3397 = vmatprep.subr.bf16.mxu0 %v4814_v28  ;;  %v4836_v28 = vld [vmem:[#allocation11 + $0x260] ss:$8 sps:$4 sm:$0xff]   ;;  %v4847_v33 = vld [vmem:[#allocation11 + $0x294] ss:$8 sps:$4 sm:$0xff]  }
 0x48f   : > { %v2615_v45 = vmax.f32 %v2587_v37, 0.0  ;;  %v2588_v46 = vadd.f32 %v5831_v50, %v2553_v39  ;;  %v4848_v37 = vld [vmem:[#allocation11 + $0x2a0] ss:$8 sps:$4 sm:$0xff]   ;;  %v4853_v39 = vld [vmem:[#allocation11 + $0x2b4] ss:$8 sps:$4 sm:$0xff]  }
 0x491   : > { %v2631_v40 = vmax.f32 %v2613_v43, %v2615_v45  ;;  %v2616_v7 = vmax.f32 %v2588_v46, 0.0  ;;  %3398 = vmatpush1.bf16.msra.mxu0 %v4812_v41  ;;  %v2511_v38 = vpop.f32.mrb[48].mxu1  ;;  %v4851_v41 = vld [vmem:[#allocation11 + $0x2b0] ss:$8 sps:$4 sm:$0xff]   ;;  %v4854_v43 = vld [vmem:[#allocation11 + $0x2c0] ss:$8 sps:$4 sm:$0xff]  }
 0x492   : > { %v2513_v27 = vpop.f32.mrb[49].mxu1  ;;  %3399 = vmatprep.subr.bf16.mxu0 %v4817_v42  ;;  %v4856_v42 = vld [vmem:[#allocation11 + $0x2c4] ss:$8 sps:$4 sm:$0xff]   ;;  %v4859_v45 = vld [vmem:[#allocation11 + $0x2d4] ss:$8 sps:$4 sm:$0xff]  }
 0x493   : > { %v2632_v16 = vmax.f32 %v2614_v11, %v2616_v7  ;;  %v2554_v44 = vmax.f32 %v2511_v38, %v2513_v27  ;;  %v2515_v8 = vpop.f32.mrb[50].mxu1  ;;  %v4857_v46 = vld [vmem:[#allocation11 + $0x2d0] ss:$8 sps:$4 sm:$0xff]   ;;  %v4865_v11 = vld [vmem:[#allocation11 + $0x2f4] ss:$8 sps:$4 sm:$0xff]  }
 0x494   : > { %v2517_v51 = vpop.f32.mrb[51].mxu1  ;;  %v4868_v7 = vld [vmem:[#allocation11 + $0x304] ss:$8 sps:$4 sm:$0xff]   ;;  %v4866_v38 = vld [vmem:[#allocation11 + $0x300] ss:$8 sps:$4 sm:$0xff]  }
 0x495   : > { %v2555_v52 = vmax.f32 %v2515_v8, %v2517_v51  ;;  %3400 = vmatpush1.bf16.msra.mxu0 %v4815_v0  ;;  %v2640_v56 = vpack.c.bf16 %v2632_v16, %v2631_v40  ;;  %v2589_v1 = vadd.f32 %v5831_v50, %v2554_v44  ;;  %v4863_v40 = vld [vmem:[#allocation11 + $0x2f0] ss:$8 sps:$4 sm:$0xff]   ;;  %v4871_v0 = vld [vmem:[#allocation11 + $0x314] ss:$8 sps:$4 sm:$0xff]   ;;  %v4872_v16 = vld [vmem:[#allocation11 + $0x320] ss:$8 sps:$4 sm:$0xff]  }
 0x496   : > { %3412 = vmatprep.subr.bf16.mxu0 %v4820_v53  ;;  %v4869_v27 = vld [vmem:[#allocation11 + $0x310] ss:$8 sps:$4 sm:$0xff]   ;;  %v4874_v53 = vld [vmem:[#allocation11 + $0x324] ss:$8 sps:$4 sm:$0xff]   ;;  %v4877_v44 = vld [vmem:[#allocation11 + $0x334] ss:$8 sps:$4 sm:$0xff]  }
 0x497   : > { %v2590_v5 = vadd.f32 %v5831_v50, %v2555_v52  ;;  %v4875_v8 = vld [vmem:[#allocation11 + $0x330] ss:$8 sps:$4 sm:$0xff]   ;;  %v4878_v51 = vld [vmem:[#allocation11 + $0x340] ss:$8 sps:$4 sm:$0xff]   ;;  %v4883_v52 = vld [vmem:[#allocation11 + $0x354] ss:$8 sps:$4 sm:$0xff]  }
 0x498   : > { %3402 = vmatmul.mubr.bf16.vlgmr.msra.gmra.mrb[112].mxu0 %v2637_v3  ;;  %v2617_v3 = vmax.f32 %v2589_v1, 0.0 }
 0x499   : > { %3413 = vmatpush1.bf16.msra.mxu0 %v4818_v54  ;;  %3444 = vmatprep.mubr.bf16.mxu0 %v2640_v56  ;;  %v2521_v59 = vpop.f32.mrb[52].mxu1  ;;  %v2618_v13 = vmax.f32 %v2590_v5, 0.0  ;;  %v4887_v54 = vld [vmem:[#allocation11 + $0x370] ss:$8 sps:$4 sm:$0xff]   ;;  %v2756_v56 = vlaneseq }
 0x49a   : > { %v2523_v61 = vpop.f32.mrb[53].mxu1  ;;  %3414 = vmatprep.subr.bf16.mxu0 %v4823_v58 }
 0x49b   : > { %v2556_v57 = vmax.f32 %v2521_v59, %v2523_v61  ;;  %v2525_v4 = vpop.f32.mrb[54].mxu1  ;;  %v2757_v58 = vshrl.u32 %v2756_v56, 7 }
 0x49c   : > { %v2527_v21 = vpop.f32.mrb[55].mxu1 }
 0x49d   : > { %v2591_v6 = vadd.f32 %v5831_v50, %v2556_v57  ;;  %v2557_v47 = vmax.f32 %v2525_v4, %v2527_v21  ;;  %3415 = vmatpush1.bf16.msra.mxu0 %v4821_v60  ;;  %v2758_v59 = vsub.s32 0, %v2757_v58  ;;  %v2754_v60 = vld [vmem:[#allocation13] sm:$0x3]  ;;  %v2762_v61 = vsub.s32 1, %v2757_v58 }
 0x49e   : > { %3416 = vmatprep.subr.bf16.mxu0 %v4826_v63 }
 0x49f   : > { %v2619_v10 = vmax.f32 %v2591_v6, 0.0  ;;  %v2592_v12 = vadd.f32 %v5831_v50, %v2557_v47  ;;  %v4838_v50 = vld [vmem:[#allocation11 + $0x264] ss:$8 sps:$4 sm:$0xff]   ;;  %v2759_v63 = vrot.slane %v2754_v60, %v2758_v59  ;;  %v2763_v1 = vrot.slane %v2754_v60, %v2762_v61 }
 0x4a1   : > { %v5876_v14 = vmax.f32 %v2617_v3, %v2619_v10  ;;  %v2620_v18 = vmax.f32 %v2592_v12, 0.0  ;;  %3417 = vmatpush1.bf16.msra.mxu0 %v4824_v55 }
 0x4a2   : > { %3418 = vmatprep.subr.bf16.mxu0 %v4829_v62 }
 0x4a3   : > { %v5878_v22 = vmax.f32 %v2618_v13, %v2620_v18 }
 0x4a5   : > { %v2641_v23 = vpack.c.bf16 %v5878_v22, %v5876_v14  ;;  %3419 = vmatpush1.bf16.msra.mxu0 %v4827_v19 }
 0x4a6   : > { %3420 = vmatprep.subr.bf16.mxu0 %v4832_v20  ;;  %v4169_v20 = vld [vmem:[#allocation16] ss:$0 sm:$0xff] }
 0x4a9   : > { %3421 = vmatpush1.bf16.msra.mxu0 %v4830_v24 }
 0x4aa   : > { %3422 = vmatprep.subr.bf16.mxu0 %v4835_v25 }
 0x4ad   : > { %3423 = vmatpush1.bf16.msra.mxu0 %v4833_v26 }
 0x4ae   : > { %3424 = vmatprep.subr.bf16.mxu0 %v4838_v50 }
 0x4b1   : > { %3425 = vmatpush1.bf16.msra.mxu0 %v4836_v28 }
 0x4b2   : > { %3426 = vmatprep.subr.bf16.mxu0 %v4841_v29 }
 0x4b5   : > { %3427 = vmatpush1.bf16.msra.mxu0 %v4839_v30 }
 0x4b6   : > { %3428 = vmatprep.subr.bf16.mxu0 %v4844_v31 }
 0x4b9   : > { %3429 = vmatpush1.bf16.msra.mxu0 %v4842_v32 }
 0x4ba   : > { %3430 = vmatprep.subr.bf16.mxu0 %v4847_v33 }
 0x4bd   : > { %3431 = vmatpush1.bf16.msra.mxu0 %v4845_v34 }
 0x4be   : > { %3432 = vmatprep.subr.bf16.mxu0 %v4850_v35 }
 0x4c1   : > { %3433 = vmatpush1.bf16.msra.mxu0 %v4848_v37 }
 0x4c2   : > { %3434 = vmatprep.subr.bf16.mxu0 %v4853_v39 }
 0x4c5   : > { %3435 = vmatpush1.bf16.msra.mxu0 %v4851_v41 }
 0x4c6   : > { %3436 = vmatprep.subr.bf16.mxu0 %v4856_v42 }
 0x4c9   : > { %3437 = vmatpush1.bf16.msra.mxu0 %v4854_v43 }
 0x4ca   : > { %3438 = vmatprep.subr.bf16.mxu0 %v4859_v45 }
 0x4cd   : > { %3439 = vmatpush1.bf16.msra.mxu0 %v4857_v46 }
 0x4ce   : > { %3440 = vmatprep.subr.bf16.mxu0 %v4862_v48 }
 0x4d1   : > { %3441 = vmatpush1.bf16.msra.mxu0 %v4860_v49 }
 0x4d2   : > { %3442 = vmatprep.subr.bf16.mxu0 %v4865_v11 }
 0x4d5   : > { %3443 = vmatpush1.bf16.msra.mxu0 %v4863_v40 }
 0x4d6   : > { %3455 = vmatprep.subr.bf16.mxu0 %v4868_v7 }
 0x4d8   : > { %3445 = vmatmul.mubr.bf16.vlgmr.msra.gmra.mrb[112].mxu0 %v2639_v15  ;;  %v4889_v15 = vld [vmem:[#allocation11 + $0x374] ss:$8 sps:$4 sm:$0xff]  }
 0x4d9   : > { %3456 = vmatpush1.bf16.msra.mxu0 %v4866_v38  ;;  %3487 = vmatprep.mubr.bf16.mxu0 %v5232_v17  ;;  %v4884_v17 = vld [vmem:[#allocation11 + $0x360] ss:$8 sps:$4 sm:$0xff]  }
 0x4da   : > { %3457 = vmatprep.subr.bf16.mxu0 %v4871_v0 }
 0x4dd   : > { %3458 = vmatpush1.bf16.msra.mxu0 %v4869_v27 }
 0x4de   : > { %3459 = vmatprep.subr.bf16.mxu0 %v4874_v53 }
 0x4e1   : > { %3460 = vmatpush1.bf16.msra.mxu0 %v4872_v16 }
 0x4e2   : > { %3461 = vmatprep.subr.bf16.mxu0 %v4877_v44 }
 0x4e5   : > { %3462 = vmatpush1.bf16.msra.mxu0 %v4875_v8 }
 0x4e6   : > { %3463 = vmatprep.subr.bf16.mxu0 %v4880_v36 }
 0x4e9   : > { %3464 = vmatpush1.bf16.msra.mxu0 %v4878_v51 }
 0x4ea   : > { %3465 = vmatprep.subr.bf16.mxu0 %v4883_v52 }
 0x4ed   : > { %3466 = vmatpush1.bf16.msra.mxu0 %v4881_v2 }
 0x4ee   : > { %3467 = vmatprep.subr.bf16.mxu0 %v4886_v9 }
 0x4f1   : > { %3468 = vmatpush1.bf16.msra.mxu0 %v4884_v17 }
 0x4f2   : > { %3469 = vmatprep.subr.bf16.mxu0 %v4889_v15 }
 0x4f5   : > { %3470 = vmatpush1.bf16.msra.mxu0 %v4887_v54 }
 0x4f8   : > { %3488 = vmatmul.mubr.bf16.vlgmr.msra.gmra.mrb[112].mxu0 %v2641_v23 }
 0x5cb   : > { %v3489_v57 = vpop.f32.mrb[112].mxu0 }
 0x5cc   : > { %v4216_v4 = vadd.f32 %v3489_v57, %v2759_v63  ;;  %v3491_v21 = vpop.f32.mrb[113].mxu0 }
 0x5cd   : > { %v4217_v5 = vadd.f32 %v3491_v21, %v2763_v1  ;;  %v3493_v6 = vpop.f32.mrb[114].mxu0 }
 0x5ce   : > { %v4218_v47 = vadd.f32 %v3493_v6, %v2759_v63  ;;  %v3495_v55 = vpop.f32.mrb[115].mxu0  ;;  %v3498_v3 = vmax.f32 %v4216_v4, 0.0 }
 0x5cf   : > { %v4219_v62 = vadd.f32 %v3495_v55, %v2763_v1  ;;  %v3499_v12 = vmax.f32 %v4217_v5, 0.0 }
 0x5d0   : > { %v3500_v10 = vmax.f32 %v4218_v47, 0.0 }
 0x5d1   : > { %v3501_v13 = vmax.f32 %v4219_v62, 0.0 }
 0x5d2   : > { %v3502_v14 = vpack.c.bf16 %v3500_v10, %v3498_v3 }
 0x5d3   : > { %v3503_v18 = vpack.c.bf16 %v3501_v13, %v3499_v12 }
 0x5d5   : > { %3671 = vmatprep.mubr.bf16.mxu1 %v3503_v18 }
 0x5d6   : > { %3672 = vmatmul.mubr.bf16.vlgmr.msra.gmra.mrb[56].mxu1 %v3502_v14 }
 0x6a9   : > { %v4210_v19 = vpop.f32.mrb[56].mxu1 }
 0x6aa   : > { %v4211_v22 = vpop.f32.mrb[57].mxu1 }
 0x6ab   : > { %v4212_v23 = vadd.f32 %v4211_v22, %v4210_v19  ;;  %v4213_v24 = vpop.f32.mrb[58].mxu1 }
 0x6ac   : > { %v4214_v25 = vpop.f32.mrb[59].mxu1 }
 0x6ad   : > { %v3674_v26 = vadd.f32 %v4212_v23, %v4169_v20  ;;  %v4215_v50 = vadd.f32 %v4214_v25, %v4213_v24 }
 0x6af   : > { %3680 = vst [vmem:[%s484_s23] sm:$0xff] %v3674_v26  ;;  %v3677_v28 = vadd.f32 %v4215_v50, %v4169_v20 }
 0x6b1   : > { %3681 = vst [vmem:[%s484_s23 + $0x8] sm:$0xff] %v3677_v28 }
 0x6b2   : > { %5143 = shalt.err (!%p5140_p12)
}
 0x6b3   : > { %s5144_s17 = scalar_lea.hbm %s5896_s3, 256  ;;  %s5148_s22 = scalar_lea.hbm %s5995_s14, 512 }
 0x6b4   : > { %p5145_p13 = scmp.ne.s32.totalorder %s5896_s3, %s5144_s17  ;;  %p5149_p8 = scmp.lt.u32.totalorder %s5896_s3, %s5995_s14 }
 0x6b5   : > { %p5150_p9 = scmp.lt.u32.totalorder %s5148_s22, %s5144_s17  ;;  %p5152_p3 = scmp.lt.u32.totalorder %s5144_s17, %s5896_s3 }
 0x6b6   : > { %p5146_p0 = pnand %p5145_p13, %p5996_p1 }
 0x6b7   : > { %p5151_p10 = por %p5150_p9, %p5149_p8 }
 0x6b8   : > { %p5147_p7 = pneg %p5146_p0 }
 0x6b9   : > { %p5153_p2 = por %p5152_p3, %p5151_p10 }
 0x6bb   : > { %p5154_p5 = pnand %p5153_p2, %p5147_p7 }
 0x6bd   : > { %5157 = shalt.err (!%p5154_p5)
}
 0x6be   : > { %s5234_s20 = smov 128   ;;  %s5235_s23 = smov 8  }
 0x6bf   : > { %4387 = dma.vmem_to_hbm [thread:$0]  (%p5996_p1), %s5891_s13, 256, %s5896_s3, %s3683_s28, %s5234_s20, %s5234_s20, %s5235_s23  }
 0x6c0 PF: > { %s5997_s25 = sld [smem:[#allocation27_spill]]  ;;  %s5998_s9 = sld [smem:[#allocation32_spill]] }
 0x6c6   : > { %s3711_s16 = sand.u32 1, %s5997_s25   ;;  %p5999_p6 = scmp.ne.s32.totalorder %s5998_s9, 0 }
 0x6c7   : > { %s3712_s1 = scalar_lea.sflag [#allocation4], %s3711_s16 }
 0x6c8   : > { %p4415_p11 = pnand %p3855_p4, %p5999_p6 }
 0x6ca   : > { %5195 = dma.done.wait (!%p4415_p11), %s3712_s1, 256  }
 0x6cb   : > { %5197 = vsyncadd (!%p4415_p11), %s3712_s1, 4294967040  ;;  %s6000_s12 = sld [smem:[#allocation29_spill]]  ;;  %s6001_s18 = sld [smem:[#allocation30_spill]] }
 0x6cc   : > { %s6002_s30 = smov %s5204_s10  ;;  %s6003_s10 = smov %s5208_s11 }
 0x6d1   : > { %p26_p12 = scmp.ge.s32.totalorder %s6000_s12, 4   ;;  %s6004_s11 = smov %s6001_s18 }
 0x6d3   :  { %28 = sbr.rel (!%p26_p12) target bundleno = 13 (0xd), region = 138 }
 0x6da   :  { %3717 = vsyncpa [#allocation3], 1 }
 0x6db   :  { %3719 = vsyncpa [#allocation3 + $0x1], 1 }
 0x6dc   :  { %3720 = vsyncpa [#allocation6], 1 }
 0x6dd   :  { %3721 = vsyncpa [#allocation9], 1 }
 0x6de   :  { %3722 = vsyncpa [#allocation12], 1 }
 0x6df   :  { %3723 = vsyncpa [#allocation15], 1 }
 0x6e0   :  { %3724 = vsyncpa [#allocation4], 1 }
 0x6e1   :  { %3726 = vsyncpa [#allocation4 + $0x1], 1 }

</bundles_post_ra>
